<compile_context>
chip_gen: v7x
topology: tpu7x:2x2x1
jax: 0.10.0
libtpu: 0.0.40
codegen_flags: <defaults>
</compile_context>

<pallas_src>
import functools
import math

import jax
import jax.numpy as jnp
from jax.experimental import pallas as pl
from jax.experimental.pallas import tpu as pltpu

D_MODEL = 32
N_HEAD = 4
D_HEAD = D_MODEL // N_HEAD
D_FF = 64
LN_EPS = 1e-5
NEG_INF = -1e9


# ---------------------------------------------------------------------------
# Single fused decoder-layer kernel
# ---------------------------------------------------------------------------
def _decoder_layer_kernel(
    x_ref, mem_ref, mask_ref,
    sa_wqkv, sa_bqkv, sa_wo, sa_bo,
    ca_wq, ca_bq, ca_wkv, ca_bkv, ca_wo, ca_bo,
    ff_w1, ff_b1, ff_w2, ff_b2,
    ln1_g, ln1_b, ln2_g, ln2_b, ln3_g, ln3_b,
    o_ref,
):
    B, T, D = x_ref.shape
    S = mem_ref.shape[1]
    H, Dh = N_HEAD, D_HEAD
    scale = 1.0 / math.sqrt(Dh)

    def layernorm(y, g_ref, b_ref):
        mu = jnp.mean(y, axis=-1, keepdims=True)
        var = jnp.mean((y - mu) ** 2, axis=-1, keepdims=True)
        return (y - mu) * jax.lax.rsqrt(var + LN_EPS) * g_ref[...] + b_ref[...]

    def mha_heads(q2d, kv2d, t_q, t_k, mask):
        # q2d: (B*t_q, D) ; kv2d: (B*t_k, 2D) laid out as [K | V].
        heads = []
        for h in range(H):  # static unroll, H = 4
            q_h = q2d[:, h * Dh:(h + 1) * Dh].reshape(B, t_q, Dh)
            k_h = kv2d[:, h * Dh:(h + 1) * Dh].reshape(B, t_k, Dh)
            v_h = kv2d[:, D + h * Dh:D + (h + 1) * Dh].reshape(B, t_k, Dh)
            s = jnp.einsum("bqd,bkd->bqk", q_h, k_h,
                           preferred_element_type=jnp.float32) * scale
            if mask is not None:
                s = s + mask
            s_max = jnp.max(s, axis=-1, keepdims=True)
            p = jnp.exp(s - s_max)
            p = p * pl.reciprocal(jnp.sum(p, axis=-1, keepdims=True), approx=True)
            heads.append(jnp.einsum("bqk,bkd->bqd", p, v_h,
                                    preferred_element_type=jnp.float32))
        return jnp.concatenate(heads, axis=-1).reshape(B * t_q, D)

    x2 = x_ref[...].reshape(B * T, D)
    mem2 = mem_ref[...].reshape(B * S, D)
    mask = mask_ref[...][None, :, :]  # (1, T, T) broadcasts over batch

    # ---- self-attention block (fused QKV) ----
    qkv = jnp.dot(x2, sa_wqkv[...], preferred_element_type=jnp.float32) + sa_bqkv[...]
    sa_ctx = mha_heads(qkv[:, :D], qkv[:, D:], T, T, mask)
    sa_out = jnp.dot(sa_ctx, sa_wo[...], preferred_element_type=jnp.float32) + sa_bo[...]
    x2 = layernorm(x2 + sa_out, ln1_g, ln1_b)

    # ---- cross-attention block (memory_mask = None -> no mask add) ----
    q_ca = jnp.dot(x2, ca_wq[...], preferred_element_type=jnp.float32) + ca_bq[...]
    kv_ca = jnp.dot(mem2, ca_wkv[...], preferred_element_type=jnp.float32) + ca_bkv[...]
    ca_ctx = mha_heads(q_ca, kv_ca, T, S, None)
    ca_out = jnp.dot(ca_ctx, ca_wo[...], preferred_element_type=jnp.float32) + ca_bo[...]
    x2 = layernorm(x2 + ca_out, ln2_g, ln2_b)

    # ---- feed-forward block ----
    hid = jnp.maximum(
        jnp.dot(x2, ff_w1[...], preferred_element_type=jnp.float32) + ff_b1[...], 0.0)
    ff = jnp.dot(hid, ff_w2[...], preferred_element_type=jnp.float32) + ff_b2[...]
    x2 = layernorm(x2 + ff, ln3_g, ln3_b)

    o_ref[...] = x2.reshape(B, T, D).astype(o_ref.dtype)


def _full_spec(shape):
    nd = len(shape)
    return pl.BlockSpec(shape, lambda i, nd=nd: (0,) * nd)


def proposed_decoder_layer(x, memory, tgt_mask, p):
    """x: (B, T, D), memory: (B, S, D), tgt_mask: (T, T) additive float."""
    B, T, D = x.shape
    args = (
        x, memory, tgt_mask,
        p["sa_wqkv"], p["sa_bqkv"], p["sa_wo"], p["sa_bo"],
        p["ca_wq"], p["ca_bq"], p["ca_wkv"], p["ca_bkv"], p["ca_wo"], p["ca_bo"],
        p["ff_w1"], p["ff_b1"], p["ff_w2"], p["ff_b2"],
        p["ln1_g"], p["ln1_b"], p["ln2_g"], p["ln2_b"], p["ln3_g"], p["ln3_b"],
    )
    return pl.pallas_call(
        _decoder_layer_kernel,
        out_shape=jax.ShapeDtypeStruct((B, T, D), x.dtype),
        grid=(1,),
        in_specs=[_full_spec(a.shape) for a in args],
        out_specs=_full_spec((B, T, D)),
        compiler_params=pltpu.CompilerParams(dimension_semantics=("arbitrary",)),
    )(*args)


# ---------------------------------------------------------------------------
# Pure-JAX reference (same math, for a correctness self-check)
# ---------------------------------------------------------------------------
def _reference(x, memory, tgt_mask, p):
    B, T, D = x.shape
    S = memory.shape[1]
    H, Dh = N_HEAD, D_HEAD

    def ln(y, g, b):
        mu = jnp.mean(y, axis=-1, keepdims=True)
        var = jnp.mean((y - mu) ** 2, axis=-1, keepdims=True)
        return (y - mu) / jnp.sqrt(var + LN_EPS) * g + b

    def mha(q_in, kv_in, wq, bq, wkv, bkv, wo, bo, mask):
        tq, tk = q_in.shape[1], kv_in.shape[1]
        q = (q_in.reshape(-1, D) @ wq + bq).reshape(B, tq, H, Dh).transpose(0, 2, 1, 3)
        kv = kv_in.reshape(-1, D) @ wkv + bkv
        k = kv[:, :D].reshape(B, tk, H, Dh).transpose(0, 2, 1, 3)
        v = kv[:, D:].reshape(B, tk, H, Dh).transpose(0, 2, 1, 3)
        s = (q @ jnp.swapaxes(k, -1, -2)) / math.sqrt(Dh)
        if mask is not None:
            s = s + mask
        a = jax.nn.softmax(s, axis=-1)
        o = (a @ v).transpose(0, 2, 1, 3).reshape(-1, D)
        return o @ wo + bo

    x2 = x.reshape(-1, D)
    sa = mha(x, x, p["sa_wqkv"][:, :D], p["sa_bqkv"][:, :D],
             p["sa_wqkv"][:, D:], p["sa_bqkv"][:, D:], p["sa_wo"], p["sa_bo"], tgt_mask)
    x2 = ln(x2 + sa, p["ln1_g"], p["ln1_b"])
    ca = mha(x2.reshape(B, T, D), memory, p["ca_wq"], p["ca_bq"],
             p["ca_wkv"], p["ca_bkv"], p["ca_wo"], p["ca_bo"], None)
    x2 = ln(x2 + ca, p["ln2_g"], p["ln2_b"])
    h = jnp.maximum(x2 @ p["ff_w1"] + p["ff_b1"], 0.0)
    f = h @ p["ff_w2"] + p["ff_b2"]
    x2 = ln(x2 + f, p["ln3_g"], p["ln3_b"])
    return x2.reshape(B, T, D)


# ---------------------------------------------------------------------------
# Deterministic parameter init (Xavier-uniform weights, zero bias, LN ones/zeros)
# ---------------------------------------------------------------------------
def make_params(key):
    D, F = D_MODEL, D_FF

    def xavier(k, fan_in, fan_out):
        lim = math.sqrt(6.0 / (fan_in + fan_out))
        return jax.random.uniform(k, (fan_in, fan_out), jnp.float32, -lim, lim)

    keys = jax.random.split(key, 10)
    p = {}
    p["sa_wqkv"] = jnp.concatenate(
        [xavier(keys[0], D, D), xavier(keys[1], D, D), xavier(keys[2], D, D)], axis=1)
    p["sa_bqkv"] = jnp.zeros((1, 3 * D), jnp.float32)
    p["sa_wo"] = xavier(keys[3], D, D)
    p["sa_bo"] = jnp.zeros((1, D), jnp.float32)
    p["ca_wq"] = xavier(keys[4], D, D)
    p["ca_bq"] = jnp.zeros((1, D), jnp.float32)
    p["ca_wkv"] = jnp.concatenate([xavier(keys[5], D, D), xavier(keys[6], D, D)], axis=1)
    p["ca_bkv"] = jnp.zeros((1, 2 * D), jnp.float32)
    p["ca_wo"] = xavier(keys[7], D, D)
    p["ca_bo"] = jnp.zeros((1, D), jnp.float32)
    p["ff_w1"] = xavier(keys[8], D, F)
    p["ff_b1"] = jnp.zeros((1, F), jnp.float32)
    p["ff_w2"] = xavier(keys[9], F, D)
    p["ff_b2"] = jnp.zeros((1, D), jnp.float32)
    for n in ("ln1", "ln2", "ln3"):
        p[f"{n}_g"] = jnp.ones((1, D), jnp.float32)
        p[f"{n}_b"] = jnp.zeros((1, D), jnp.float32)
    return p


if __name__ == "__main__":
    B, T, S = 2, 8, 8
    root = jax.random.PRNGKey(0)
    k_x, k_mem, k_params = jax.random.split(root, 3)

    x = jax.random.normal(k_x, (B, T, D_MODEL), jnp.float32)
    memory = jax.random.normal(k_mem, (B, S, D_MODEL), jnp.float32)

    # causal additive tgt_mask (0 on/below diagonal, -inf above), torch convention
    causal = jnp.tril(jnp.ones((T, T), jnp.bool_))
    tgt_mask = jnp.where(causal, 0.0, NEG_INF).astype(jnp.float32)

    params = make_params(k_params)

    out = jax.jit(proposed_decoder_layer)(x, memory, tgt_mask, params)
    jax.block_until_ready(out)
    assert out.shape == (B, T, D_MODEL)

    # correctness self-check vs pure-JAX reference (loose tol: approx reciprocal in softmax)
    ref = _reference(x, memory, tgt_mask, params)
    assert jnp.allclose(out, ref, atol=1e-2, rtol=1e-2)

    # TODO(synk): dropout is identity in eval mode and intentionally omitted.
    print("KERNEL_OK")
</pallas_src>

<mosaic_0001>
module attributes {stable_mosaic.version = 11 : i64} {
  func.func @_decoder_layer_kernel(%arg0: i32, %arg1: memref<2x8x32xf32, #tpu.memory_space<vmem>>, %arg2: memref<2x8x32xf32, #tpu.memory_space<vmem>>, %arg3: memref<8x8xf32, #tpu.memory_space<vmem>>, %arg4: memref<32x96xf32, #tpu.memory_space<vmem>>, %arg5: memref<1x96xf32, #tpu.memory_space<vmem>>, %arg6: memref<32x32xf32, #tpu.memory_space<vmem>>, %arg7: memref<1x32xf32, #tpu.memory_space<vmem>>, %arg8: memref<32x32xf32, #tpu.memory_space<vmem>>, %arg9: memref<1x32xf32, #tpu.memory_space<vmem>>, %arg10: memref<32x64xf32, #tpu.memory_space<vmem>>, %arg11: memref<1x64xf32, #tpu.memory_space<vmem>>, %arg12: memref<32x32xf32, #tpu.memory_space<vmem>>, %arg13: memref<1x32xf32, #tpu.memory_space<vmem>>, %arg14: memref<32x64xf32, #tpu.memory_space<vmem>>, %arg15: memref<1x64xf32, #tpu.memory_space<vmem>>, %arg16: memref<64x32xf32, #tpu.memory_space<vmem>>, %arg17: memref<1x32xf32, #tpu.memory_space<vmem>>, %arg18: memref<1x32xf32, #tpu.memory_space<vmem>>, %arg19: memref<1x32xf32, #tpu.memory_space<vmem>>, %arg20: memref<1x32xf32, #tpu.memory_space<vmem>>, %arg21: memref<1x32xf32, #tpu.memory_space<vmem>>, %arg22: memref<1x32xf32, #tpu.memory_space<vmem>>, %arg23: memref<1x32xf32, #tpu.memory_space<vmem>>, %arg24: memref<2x8x32xf32, #tpu.memory_space<vmem>>) attributes {dimension_semantics = [#tpu.dimension_semantics<arbitrary>], iteration_bounds = array<i64: 1>, scalar_prefetch = 0 : i64, scratch_operands = 0 : i64, tpu.core_type = #tpu.core_type<tc>, window_params = [{pipeline_mode = #tpu.pipeline_mode<synchronous>, transform_indices = @transform_0, window_bounds = array<i64: 2, 8, 32>}, {pipeline_mode = #tpu.pipeline_mode<synchronous>, transform_indices = @transform_1, window_bounds = array<i64: 2, 8, 32>}, {pipeline_mode = #tpu.pipeline_mode<synchronous>, transform_indices = @transform_2, window_bounds = array<i64: 8, 8>}, {pipeline_mode = #tpu.pipeline_mode<synchronous>, transform_indices = @transform_3, window_bounds = array<i64: 32, 96>}, {pipeline_mode = #tpu.pipeline_mode<synchronous>, transform_indices = @transform_4, window_bounds = array<i64: 1, 96>}, {pipeline_mode = #tpu.pipeline_mode<synchronous>, transform_indices = @transform_5, window_bounds = array<i64: 32, 32>}, {pipeline_mode = #tpu.pipeline_mode<synchronous>, transform_indices = @transform_6, window_bounds = array<i64: 1, 32>}, {pipeline_mode = #tpu.pipeline_mode<synchronous>, transform_indices = @transform_7, window_bounds = array<i64: 32, 32>}, {pipeline_mode = #tpu.pipeline_mode<synchronous>, transform_indices = @transform_8, window_bounds = array<i64: 1, 32>}, {pipeline_mode = #tpu.pipeline_mode<synchronous>, transform_indices = @transform_9, window_bounds = array<i64: 32, 64>}, {pipeline_mode = #tpu.pipeline_mode<synchronous>, transform_indices = @transform_10, window_bounds = array<i64: 1, 64>}, {pipeline_mode = #tpu.pipeline_mode<synchronous>, transform_indices = @transform_11, window_bounds = array<i64: 32, 32>}, {pipeline_mode = #tpu.pipeline_mode<synchronous>, transform_indices = @transform_12, window_bounds = array<i64: 1, 32>}, {pipeline_mode = #tpu.pipeline_mode<synchronous>, transform_indices = @transform_13, window_bounds = array<i64: 32, 64>}, {pipeline_mode = #tpu.pipeline_mode<synchronous>, transform_indices = @transform_14, window_bounds = array<i64: 1, 64>}, {pipeline_mode = #tpu.pipeline_mode<synchronous>, transform_indices = @transform_15, window_bounds = array<i64: 64, 32>}, {pipeline_mode = #tpu.pipeline_mode<synchronous>, transform_indices = @transform_16, window_bounds = array<i64: 1, 32>}, {pipeline_mode = #tpu.pipeline_mode<synchronous>, transform_indices = @transform_17, window_bounds = array<i64: 1, 32>}, {pipeline_mode = #tpu.pipeline_mode<synchronous>, transform_indices = @transform_18, window_bounds = array<i64: 1, 32>}, {pipeline_mode = #tpu.pipeline_mode<synchronous>, transform_indices = @transform_19, window_bounds = array<i64: 1, 32>}, {pipeline_mode = #tpu.pipeline_mode<synchronous>, transform_indices = @transform_20, window_bounds = array<i64: 1, 32>}, {pipeline_mode = #tpu.pipeline_mode<synchronous>, transform_indices = @transform_21, window_bounds = array<i64: 1, 32>}, {pipeline_mode = #tpu.pipeline_mode<synchronous>, transform_indices = @transform_22, window_bounds = array<i64: 1, 32>}, {pipeline_mode = #tpu.pipeline_mode<synchronous>, transform_indices = @transform_23, window_bounds = array<i64: 2, 8, 32>}]} {
    %c0 = arith.constant 0 : index
    %c0_0 = arith.constant 0 : index
    %c0_1 = arith.constant 0 : index
    %0 = vector.load %arg1[%c0, %c0_0, %c0_1] : memref<2x8x32xf32, #tpu.memory_space<vmem>>, vector<2x8x32xf32>
    %1 = vector.shape_cast %0 : vector<2x8x32xf32> to vector<16x32xf32>
    %c0_2 = arith.constant 0 : index
    %c0_3 = arith.constant 0 : index
    %c0_4 = arith.constant 0 : index
    %2 = vector.load %arg2[%c0_2, %c0_3, %c0_4] : memref<2x8x32xf32, #tpu.memory_space<vmem>>, vector<2x8x32xf32>
    %3 = vector.shape_cast %2 : vector<2x8x32xf32> to vector<16x32xf32>
    %c0_5 = arith.constant 0 : index
    %c0_6 = arith.constant 0 : index
    %4 = vector.load %arg3[%c0_5, %c0_6] : memref<8x8xf32, #tpu.memory_space<vmem>>, vector<8x8xf32>
    %5 = vector.shape_cast %4 : vector<8x8xf32> to vector<1x8x8xf32>
    %c0_7 = arith.constant 0 : index
    %c0_8 = arith.constant 0 : index
    %6 = vector.load %arg4[%c0_7, %c0_8] : memref<32x96xf32, #tpu.memory_space<vmem>>, vector<32x96xf32>
    %cst = arith.constant dense<0.000000e+00> : vector<16x96xf32>
    %7 = tpu.matmul %1, %6, %cst {dimension_numbers = #tpu.dot_dimension_numbers<[1], [0], [0], [1], [0, 0, 1, 1], [], []>} : vector<16x32xf32>, vector<32x96xf32>, vector<16x96xf32> -> vector<16x96xf32>
    %c0_9 = arith.constant 0 : index
    %c0_10 = arith.constant 0 : index
    %8 = vector.load %arg5[%c0_9, %c0_10] : memref<1x96xf32, #tpu.memory_space<vmem>>, vector<1x96xf32>
    %9 = vector.broadcast %8 : vector<1x96xf32> to vector<16x96xf32>
    %10 = arith.addf %7, %9 : vector<16x96xf32>
    %11 = vector.extract_strided_slice %10 {offsets = [0, 0], sizes = [16, 32], strides = [1, 1]} : vector<16x96xf32> to vector<16x32xf32>
    %12 = vector.extract_strided_slice %10 {offsets = [0, 32], sizes = [16, 64], strides = [1, 1]} : vector<16x96xf32> to vector<16x64xf32>
    %13 = vector.extract_strided_slice %11 {offsets = [0, 0], sizes = [16, 8], strides = [1, 1]} : vector<16x32xf32> to vector<16x8xf32>
    %14 = vector.shape_cast %13 : vector<16x8xf32> to vector<2x8x8xf32>
    %15 = vector.extract_strided_slice %12 {offsets = [0, 0], sizes = [16, 8], strides = [1, 1]} : vector<16x64xf32> to vector<16x8xf32>
    %16 = vector.shape_cast %15 : vector<16x8xf32> to vector<2x8x8xf32>
    %17 = vector.extract_strided_slice %12 {offsets = [0, 32], sizes = [16, 8], strides = [1, 1]} : vector<16x64xf32> to vector<16x8xf32>
    %18 = vector.shape_cast %17 : vector<16x8xf32> to vector<2x8x8xf32>
    "tpu.trace_start"() <{level = 10 : i32, message = "bqd,bkd->bqk"}> : () -> ()
    %cst_11 = arith.constant dense<0.000000e+00> : vector<2x8x8xf32>
    %19 = tpu.matmul %14, %16, %cst_11 {dimension_numbers = #tpu.dot_dimension_numbers<[2], [2], [1], [1], [0, 0, 0, 1, 1, 1], [0], [0]>} : vector<2x8x8xf32>, vector<2x8x8xf32>, vector<2x8x8xf32> -> vector<2x8x8xf32>
    "tpu.trace_stop"() : () -> ()
    %cst_12 = arith.constant 0.353553385 : f32
    %20 = vector.broadcast %cst_12 : f32 to vector<2x8x8xf32>
    %21 = arith.mulf %19, %20 : vector<2x8x8xf32>
    %22 = vector.broadcast %5 : vector<1x8x8xf32> to vector<2x8x8xf32>
    %23 = arith.addf %21, %22 : vector<2x8x8xf32>
    %cst_13 = arith.constant dense<0xFF800000> : vector<2x8xf32>
    %24 = vector.multi_reduction <maximumf>, %23, %cst_13 [2] : vector<2x8x8xf32> to vector<2x8xf32>
    %25 = vector.shape_cast %24 : vector<2x8xf32> to vector<2x8x1xf32>
    %26 = vector.broadcast %25 : vector<2x8x1xf32> to vector<2x8x8xf32>
    %27 = arith.subf %23, %26 : vector<2x8x8xf32>
    %28 = math.exp %27 : vector<2x8x8xf32>
    %cst_14 = arith.constant dense<0.000000e+00> : vector<2x8xf32>
    %29 = vector.multi_reduction <add>, %28, %cst_14 [2] : vector<2x8x8xf32> to vector<2x8xf32>
    %30 = vector.shape_cast %29 : vector<2x8xf32> to vector<2x8x1xf32>
    %31 = tpu.reciprocal %30 {approx = true} : vector<2x8x1xf32> -> vector<2x8x1xf32>
    %32 = vector.broadcast %31 : vector<2x8x1xf32> to vector<2x8x8xf32>
    %33 = arith.mulf %28, %32 : vector<2x8x8xf32>
    "tpu.trace_start"() <{level = 10 : i32, message = "bqk,bkd->bqd"}> : () -> ()
    %cst_15 = arith.constant dense<0.000000e+00> : vector<2x8x8xf32>
    %34 = tpu.matmul %33, %18, %cst_15 {dimension_numbers = #tpu.dot_dimension_numbers<[2], [1], [1], [2], [0, 0, 0, 1, 1, 2], [0], [0]>} : vector<2x8x8xf32>, vector<2x8x8xf32>, vector<2x8x8xf32> -> vector<2x8x8xf32>
    "tpu.trace_stop"() : () -> ()
    %35 = vector.extract_strided_slice %11 {offsets = [0, 8], sizes = [16, 8], strides = [1, 1]} : vector<16x32xf32> to vector<16x8xf32>
    %36 = vector.shape_cast %35 : vector<16x8xf32> to vector<2x8x8xf32>
    %37 = vector.extract_strided_slice %12 {offsets = [0, 8], sizes = [16, 8], strides = [1, 1]} : vector<16x64xf32> to vector<16x8xf32>
    %38 = vector.shape_cast %37 : vector<16x8xf32> to vector<2x8x8xf32>
    %39 = vector.extract_strided_slice %12 {offsets = [0, 40], sizes = [16, 8], strides = [1, 1]} : vector<16x64xf32> to vector<16x8xf32>
    %40 = vector.shape_cast %39 : vector<16x8xf32> to vector<2x8x8xf32>
    "tpu.trace_start"() <{level = 10 : i32, message = "bqd,bkd->bqk"}> : () -> ()
    %cst_16 = arith.constant dense<0.000000e+00> : vector<2x8x8xf32>
    %41 = tpu.matmul %36, %38, %cst_16 {dimension_numbers = #tpu.dot_dimension_numbers<[2], [2], [1], [1], [0, 0, 0, 1, 1, 1], [0], [0]>} : vector<2x8x8xf32>, vector<2x8x8xf32>, vector<2x8x8xf32> -> vector<2x8x8xf32>
    "tpu.trace_stop"() : () -> ()
    %cst_17 = arith.constant 0.353553385 : f32
    %42 = vector.broadcast %cst_17 : f32 to vector<2x8x8xf32>
    %43 = arith.mulf %41, %42 : vector<2x8x8xf32>
    %44 = vector.broadcast %5 : vector<1x8x8xf32> to vector<2x8x8xf32>
    %45 = arith.addf %43, %44 : vector<2x8x8xf32>
    %cst_18 = arith.constant dense<0xFF800000> : vector<2x8xf32>
    %46 = vector.multi_reduction <maximumf>, %45, %cst_18 [2] : vector<2x8x8xf32> to vector<2x8xf32>
    %47 = vector.shape_cast %46 : vector<2x8xf32> to vector<2x8x1xf32>
    %48 = vector.broadcast %47 : vector<2x8x1xf32> to vector<2x8x8xf32>
    %49 = arith.subf %45, %48 : vector<2x8x8xf32>
    %50 = math.exp %49 : vector<2x8x8xf32>
    %cst_19 = arith.constant dense<0.000000e+00> : vector<2x8xf32>
    %51 = vector.multi_reduction <add>, %50, %cst_19 [2] : vector<2x8x8xf32> to vector<2x8xf32>
    %52 = vector.shape_cast %51 : vector<2x8xf32> to vector<2x8x1xf32>
    %53 = tpu.reciprocal %52 {approx = true} : vector<2x8x1xf32> -> vector<2x8x1xf32>
    %54 = vector.broadcast %53 : vector<2x8x1xf32> to vector<2x8x8xf32>
    %55 = arith.mulf %50, %54 : vector<2x8x8xf32>
    "tpu.trace_start"() <{level = 10 : i32, message = "bqk,bkd->bqd"}> : () -> ()
    %cst_20 = arith.constant dense<0.000000e+00> : vector<2x8x8xf32>
    %56 = tpu.matmul %55, %40, %cst_20 {dimension_numbers = #tpu.dot_dimension_numbers<[2], [1], [1], [2], [0, 0, 0, 1, 1, 2], [0], [0]>} : vector<2x8x8xf32>, vector<2x8x8xf32>, vector<2x8x8xf32> -> vector<2x8x8xf32>
    "tpu.trace_stop"() : () -> ()
    %57 = vector.extract_strided_slice %11 {offsets = [0, 16], sizes = [16, 8], strides = [1, 1]} : vector<16x32xf32> to vector<16x8xf32>
    %58 = vector.shape_cast %57 : vector<16x8xf32> to vector<2x8x8xf32>
    %59 = vector.extract_strided_slice %12 {offsets = [0, 16], sizes = [16, 8], strides = [1, 1]} : vector<16x64xf32> to vector<16x8xf32>
    %60 = vector.shape_cast %59 : vector<16x8xf32> to vector<2x8x8xf32>
    %61 = vector.extract_strided_slice %12 {offsets = [0, 48], sizes = [16, 8], strides = [1, 1]} : vector<16x64xf32> to vector<16x8xf32>
    %62 = vector.shape_cast %61 : vector<16x8xf32> to vector<2x8x8xf32>
    "tpu.trace_start"() <{level = 10 : i32, message = "bqd,bkd->bqk"}> : () -> ()
    %cst_21 = arith.constant dense<0.000000e+00> : vector<2x8x8xf32>
    %63 = tpu.matmul %58, %60, %cst_21 {dimension_numbers = #tpu.dot_dimension_numbers<[2], [2], [1], [1], [0, 0, 0, 1, 1, 1], [0], [0]>} : vector<2x8x8xf32>, vector<2x8x8xf32>, vector<2x8x8xf32> -> vector<2x8x8xf32>
    "tpu.trace_stop"() : () -> ()
    %cst_22 = arith.constant 0.353553385 : f32
    %64 = vector.broadcast %cst_22 : f32 to vector<2x8x8xf32>
    %65 = arith.mulf %63, %64 : vector<2x8x8xf32>
    %66 = vector.broadcast %5 : vector<1x8x8xf32> to vector<2x8x8xf32>
    %67 = arith.addf %65, %66 : vector<2x8x8xf32>
    %cst_23 = arith.constant dense<0xFF800000> : vector<2x8xf32>
    %68 = vector.multi_reduction <maximumf>, %67, %cst_23 [2] : vector<2x8x8xf32> to vector<2x8xf32>
    %69 = vector.shape_cast %68 : vector<2x8xf32> to vector<2x8x1xf32>
    %70 = vector.broadcast %69 : vector<2x8x1xf32> to vector<2x8x8xf32>
    %71 = arith.subf %67, %70 : vector<2x8x8xf32>
    %72 = math.exp %71 : vector<2x8x8xf32>
    %cst_24 = arith.constant dense<0.000000e+00> : vector<2x8xf32>
    %73 = vector.multi_reduction <add>, %72, %cst_24 [2] : vector<2x8x8xf32> to vector<2x8xf32>
    %74 = vector.shape_cast %73 : vector<2x8xf32> to vector<2x8x1xf32>
    %75 = tpu.reciprocal %74 {approx = true} : vector<2x8x1xf32> -> vector<2x8x1xf32>
    %76 = vector.broadcast %75 : vector<2x8x1xf32> to vector<2x8x8xf32>
    %77 = arith.mulf %72, %76 : vector<2x8x8xf32>
    "tpu.trace_start"() <{level = 10 : i32, message = "bqk,bkd->bqd"}> : () -> ()
    %cst_25 = arith.constant dense<0.000000e+00> : vector<2x8x8xf32>
    %78 = tpu.matmul %77, %62, %cst_25 {dimension_numbers = #tpu.dot_dimension_numbers<[2], [1], [1], [2], [0, 0, 0, 1, 1, 2], [0], [0]>} : vector<2x8x8xf32>, vector<2x8x8xf32>, vector<2x8x8xf32> -> vector<2x8x8xf32>
    "tpu.trace_stop"() : () -> ()
    %79 = vector.extract_strided_slice %11 {offsets = [0, 24], sizes = [16, 8], strides = [1, 1]} : vector<16x32xf32> to vector<16x8xf32>
    %80 = vector.shape_cast %79 : vector<16x8xf32> to vector<2x8x8xf32>
    %81 = vector.extract_strided_slice %12 {offsets = [0, 24], sizes = [16, 8], strides = [1, 1]} : vector<16x64xf32> to vector<16x8xf32>
    %82 = vector.shape_cast %81 : vector<16x8xf32> to vector<2x8x8xf32>
    %83 = vector.extract_strided_slice %12 {offsets = [0, 56], sizes = [16, 8], strides = [1, 1]} : vector<16x64xf32> to vector<16x8xf32>
    %84 = vector.shape_cast %83 : vector<16x8xf32> to vector<2x8x8xf32>
    "tpu.trace_start"() <{level = 10 : i32, message = "bqd,bkd->bqk"}> : () -> ()
    %cst_26 = arith.constant dense<0.000000e+00> : vector<2x8x8xf32>
    %85 = tpu.matmul %80, %82, %cst_26 {dimension_numbers = #tpu.dot_dimension_numbers<[2], [2], [1], [1], [0, 0, 0, 1, 1, 1], [0], [0]>} : vector<2x8x8xf32>, vector<2x8x8xf32>, vector<2x8x8xf32> -> vector<2x8x8xf32>
    "tpu.trace_stop"() : () -> ()
    %cst_27 = arith.constant 0.353553385 : f32
    %86 = vector.broadcast %cst_27 : f32 to vector<2x8x8xf32>
    %87 = arith.mulf %85, %86 : vector<2x8x8xf32>
    %88 = vector.broadcast %5 : vector<1x8x8xf32> to vector<2x8x8xf32>
    %89 = arith.addf %87, %88 : vector<2x8x8xf32>
    %cst_28 = arith.constant dense<0xFF800000> : vector<2x8xf32>
    %90 = vector.multi_reduction <maximumf>, %89, %cst_28 [2] : vector<2x8x8xf32> to vector<2x8xf32>
    %91 = vector.shape_cast %90 : vector<2x8xf32> to vector<2x8x1xf32>
    %92 = vector.broadcast %91 : vector<2x8x1xf32> to vector<2x8x8xf32>
    %93 = arith.subf %89, %92 : vector<2x8x8xf32>
    %94 = math.exp %93 : vector<2x8x8xf32>
    %cst_29 = arith.constant dense<0.000000e+00> : vector<2x8xf32>
    %95 = vector.multi_reduction <add>, %94, %cst_29 [2] : vector<2x8x8xf32> to vector<2x8xf32>
    %96 = vector.shape_cast %95 : vector<2x8xf32> to vector<2x8x1xf32>
    %97 = tpu.reciprocal %96 {approx = true} : vector<2x8x1xf32> -> vector<2x8x1xf32>
    %98 = vector.broadcast %97 : vector<2x8x1xf32> to vector<2x8x8xf32>
    %99 = arith.mulf %94, %98 : vector<2x8x8xf32>
    "tpu.trace_start"() <{level = 10 : i32, message = "bqk,bkd->bqd"}> : () -> ()
    %cst_30 = arith.constant dense<0.000000e+00> : vector<2x8x8xf32>
    %100 = tpu.matmul %99, %84, %cst_30 {dimension_numbers = #tpu.dot_dimension_numbers<[2], [1], [1], [2], [0, 0, 0, 1, 1, 2], [0], [0]>} : vector<2x8x8xf32>, vector<2x8x8xf32>, vector<2x8x8xf32> -> vector<2x8x8xf32>
    "tpu.trace_stop"() : () -> ()
    %101 = tpu.concatenate %34, %56, %78, %100 in 2 : vector<2x8x8xf32>, vector<2x8x8xf32>, vector<2x8x8xf32>, vector<2x8x8xf32> -> vector<2x8x32xf32>
    %102 = vector.shape_cast %101 : vector<2x8x32xf32> to vector<16x32xf32>
    %c0_31 = arith.constant 0 : index
    %c0_32 = arith.constant 0 : index
    %103 = vector.load %arg6[%c0_31, %c0_32] : memref<32x32xf32, #tpu.memory_space<vmem>>, vector<32x32xf32>
    %cst_33 = arith.constant dense<0.000000e+00> : vector<16x32xf32>
    %104 = tpu.matmul %102, %103, %cst_33 {dimension_numbers = #tpu.dot_dimension_numbers<[1], [0], [0], [1], [0, 0, 1, 1], [], []>} : vector<16x32xf32>, vector<32x32xf32>, vector<16x32xf32> -> vector<16x32xf32>
    %c0_34 = arith.constant 0 : index
    %c0_35 = arith.constant 0 : index
    %105 = vector.load %arg7[%c0_34, %c0_35] : memref<1x32xf32, #tpu.memory_space<vmem>>, vector<1x32xf32>
    %106 = vector.broadcast %105 : vector<1x32xf32> to vector<16x32xf32>
    %107 = arith.addf %104, %106 : vector<16x32xf32>
    %108 = arith.addf %1, %107 : vector<16x32xf32>
    %cst_36 = arith.constant dense<0.000000e+00> : vector<16xf32>
    %109 = vector.multi_reduction <add>, %108, %cst_36 [1] : vector<16x32xf32> to vector<16xf32>
    %110 = vector.shape_cast %109 : vector<16xf32> to vector<16x1xf32>
    %cst_37 = arith.constant 3.200000e+01 : f32
    %111 = vector.broadcast %cst_37 : f32 to vector<16x1xf32>
    %112 = arith.divf %110, %111 : vector<16x1xf32>
    %113 = vector.broadcast %112 : vector<16x1xf32> to vector<16x32xf32>
    %114 = arith.subf %108, %113 : vector<16x32xf32>
    %115 = arith.mulf %114, %114 : vector<16x32xf32>
    %cst_38 = arith.constant dense<0.000000e+00> : vector<16xf32>
    %116 = vector.multi_reduction <add>, %115, %cst_38 [1] : vector<16x32xf32> to vector<16xf32>
    %117 = vector.shape_cast %116 : vector<16xf32> to vector<16x1xf32>
    %cst_39 = arith.constant 3.200000e+01 : f32
    %118 = vector.broadcast %cst_39 : f32 to vector<16x1xf32>
    %119 = arith.divf %117, %118 : vector<16x1xf32>
    %120 = vector.broadcast %112 : vector<16x1xf32> to vector<16x32xf32>
    %121 = arith.subf %108, %120 : vector<16x32xf32>
    %cst_40 = arith.constant 9.99999974E-6 : f32
    %122 = vector.broadcast %cst_40 : f32 to vector<16x1xf32>
    %123 = arith.addf %119, %122 : vector<16x1xf32>
    %124 = math.rsqrt %123 : vector<16x1xf32>
    %125 = vector.broadcast %124 : vector<16x1xf32> to vector<16x32xf32>
    %126 = arith.mulf %121, %125 : vector<16x32xf32>
    %c0_41 = arith.constant 0 : index
    %c0_42 = arith.constant 0 : index
    %127 = vector.load %arg18[%c0_41, %c0_42] : memref<1x32xf32, #tpu.memory_space<vmem>>, vector<1x32xf32>
    %128 = vector.broadcast %127 : vector<1x32xf32> to vector<16x32xf32>
    %129 = arith.mulf %126, %128 : vector<16x32xf32>
    %c0_43 = arith.constant 0 : index
    %c0_44 = arith.constant 0 : index
    %130 = vector.load %arg19[%c0_43, %c0_44] : memref<1x32xf32, #tpu.memory_space<vmem>>, vector<1x32xf32>
    %131 = vector.broadcast %130 : vector<1x32xf32> to vector<16x32xf32>
    %132 = arith.addf %129, %131 : vector<16x32xf32>
    %c0_45 = arith.constant 0 : index
    %c0_46 = arith.constant 0 : index
    %133 = vector.load %arg8[%c0_45, %c0_46] : memref<32x32xf32, #tpu.memory_space<vmem>>, vector<32x32xf32>
    %cst_47 = arith.constant dense<0.000000e+00> : vector<16x32xf32>
    %134 = tpu.matmul %132, %133, %cst_47 {dimension_numbers = #tpu.dot_dimension_numbers<[1], [0], [0], [1], [0, 0, 1, 1], [], []>} : vector<16x32xf32>, vector<32x32xf32>, vector<16x32xf32> -> vector<16x32xf32>
    %c0_48 = arith.constant 0 : index
    %c0_49 = arith.constant 0 : index
    %135 = vector.load %arg9[%c0_48, %c0_49] : memref<1x32xf32, #tpu.memory_space<vmem>>, vector<1x32xf32>
    %136 = vector.broadcast %135 : vector<1x32xf32> to vector<16x32xf32>
    %137 = arith.addf %134, %136 : vector<16x32xf32>
    %c0_50 = arith.constant 0 : index
    %c0_51 = arith.constant 0 : index
    %138 = vector.load %arg10[%c0_50, %c0_51] : memref<32x64xf32, #tpu.memory_space<vmem>>, vector<32x64xf32>
    %cst_52 = arith.constant dense<0.000000e+00> : vector<16x64xf32>
    %139 = tpu.matmul %3, %138, %cst_52 {dimension_numbers = #tpu.dot_dimension_numbers<[1], [0], [0], [1], [0, 0, 1, 1], [], []>} : vector<16x32xf32>, vector<32x64xf32>, vector<16x64xf32> -> vector<16x64xf32>
    %c0_53 = arith.constant 0 : index
    %c0_54 = arith.constant 0 : index
    %140 = vector.load %arg11[%c0_53, %c0_54] : memref<1x64xf32, #tpu.memory_space<vmem>>, vector<1x64xf32>
    %141 = vector.broadcast %140 : vector<1x64xf32> to vector<16x64xf32>
    %142 = arith.addf %139, %141 : vector<16x64xf32>
    %143 = vector.extract_strided_slice %137 {offsets = [0, 0], sizes = [16, 8], strides = [1, 1]} : vector<16x32xf32> to vector<16x8xf32>
    %144 = vector.shape_cast %143 : vector<16x8xf32> to vector<2x8x8xf32>
    %145 = vector.extract_strided_slice %142 {offsets = [0, 0], sizes = [16, 8], strides = [1, 1]} : vector<16x64xf32> to vector<16x8xf32>
    %146 = vector.shape_cast %145 : vector<16x8xf32> to vector<2x8x8xf32>
    %147 = vector.extract_strided_slice %142 {offsets = [0, 32], sizes = [16, 8], strides = [1, 1]} : vector<16x64xf32> to vector<16x8xf32>
    %148 = vector.shape_cast %147 : vector<16x8xf32> to vector<2x8x8xf32>
    "tpu.trace_start"() <{level = 10 : i32, message = "bqd,bkd->bqk"}> : () -> ()
    %cst_55 = arith.constant dense<0.000000e+00> : vector<2x8x8xf32>
    %149 = tpu.matmul %144, %146, %cst_55 {dimension_numbers = #tpu.dot_dimension_numbers<[2], [2], [1], [1], [0, 0, 0, 1, 1, 1], [0], [0]>} : vector<2x8x8xf32>, vector<2x8x8xf32>, vector<2x8x8xf32> -> vector<2x8x8xf32>
    "tpu.trace_stop"() : () -> ()
    %cst_56 = arith.constant 0.353553385 : f32
    %150 = vector.broadcast %cst_56 : f32 to vector<2x8x8xf32>
    %151 = arith.mulf %149, %150 : vector<2x8x8xf32>
    %cst_57 = arith.constant dense<0xFF800000> : vector<2x8xf32>
    %152 = vector.multi_reduction <maximumf>, %151, %cst_57 [2] : vector<2x8x8xf32> to vector<2x8xf32>
    %153 = vector.shape_cast %152 : vector<2x8xf32> to vector<2x8x1xf32>
    %154 = vector.broadcast %153 : vector<2x8x1xf32> to vector<2x8x8xf32>
    %155 = arith.subf %151, %154 : vector<2x8x8xf32>
    %156 = math.exp %155 : vector<2x8x8xf32>
    %cst_58 = arith.constant dense<0.000000e+00> : vector<2x8xf32>
    %157 = vector.multi_reduction <add>, %156, %cst_58 [2] : vector<2x8x8xf32> to vector<2x8xf32>
    %158 = vector.shape_cast %157 : vector<2x8xf32> to vector<2x8x1xf32>
    %159 = tpu.reciprocal %158 {approx = true} : vector<2x8x1xf32> -> vector<2x8x1xf32>
    %160 = vector.broadcast %159 : vector<2x8x1xf32> to vector<2x8x8xf32>
    %161 = arith.mulf %156, %160 : vector<2x8x8xf32>
    "tpu.trace_start"() <{level = 10 : i32, message = "bqk,bkd->bqd"}> : () -> ()
    %cst_59 = arith.constant dense<0.000000e+00> : vector<2x8x8xf32>
    %162 = tpu.matmul %161, %148, %cst_59 {dimension_numbers = #tpu.dot_dimension_numbers<[2], [1], [1], [2], [0, 0, 0, 1, 1, 2], [0], [0]>} : vector<2x8x8xf32>, vector<2x8x8xf32>, vector<2x8x8xf32> -> vector<2x8x8xf32>
    "tpu.trace_stop"() : () -> ()
    %163 = vector.extract_strided_slice %137 {offsets = [0, 8], sizes = [16, 8], strides = [1, 1]} : vector<16x32xf32> to vector<16x8xf32>
    %164 = vector.shape_cast %163 : vector<16x8xf32> to vector<2x8x8xf32>
    %165 = vector.extract_strided_slice %142 {offsets = [0, 8], sizes = [16, 8], strides = [1, 1]} : vector<16x64xf32> to vector<16x8xf32>
    %166 = vector.shape_cast %165 : vector<16x8xf32> to vector<2x8x8xf32>
    %167 = vector.extract_strided_slice %142 {offsets = [0, 40], sizes = [16, 8], strides = [1, 1]} : vector<16x64xf32> to vector<16x8xf32>
    %168 = vector.shape_cast %167 : vector<16x8xf32> to vector<2x8x8xf32>
    "tpu.trace_start"() <{level = 10 : i32, message = "bqd,bkd->bqk"}> : () -> ()
    %cst_60 = arith.constant dense<0.000000e+00> : vector<2x8x8xf32>
    %169 = tpu.matmul %164, %166, %cst_60 {dimension_numbers = #tpu.dot_dimension_numbers<[2], [2], [1], [1], [0, 0, 0, 1, 1, 1], [0], [0]>} : vector<2x8x8xf32>, vector<2x8x8xf32>, vector<2x8x8xf32> -> vector<2x8x8xf32>
    "tpu.trace_stop"() : () -> ()
    %cst_61 = arith.constant 0.353553385 : f32
    %170 = vector.broadcast %cst_61 : f32 to vector<2x8x8xf32>
    %171 = arith.mulf %169, %170 : vector<2x8x8xf32>
    %cst_62 = arith.constant dense<0xFF800000> : vector<2x8xf32>
    %172 = vector.multi_reduction <maximumf>, %171, %cst_62 [2] : vector<2x8x8xf32> to vector<2x8xf32>
    %173 = vector.shape_cast %172 : vector<2x8xf32> to vector<2x8x1xf32>
    %174 = vector.broadcast %173 : vector<2x8x1xf32> to vector<2x8x8xf32>
    %175 = arith.subf %171, %174 : vector<2x8x8xf32>
    %176 = math.exp %175 : vector<2x8x8xf32>
    %cst_63 = arith.constant dense<0.000000e+00> : vector<2x8xf32>
    %177 = vector.multi_reduction <add>, %176, %cst_63 [2] : vector<2x8x8xf32> to vector<2x8xf32>
    %178 = vector.shape_cast %177 : vector<2x8xf32> to vector<2x8x1xf32>
    %179 = tpu.reciprocal %178 {approx = true} : vector<2x8x1xf32> -> vector<2x8x1xf32>
    %180 = vector.broadcast %179 : vector<2x8x1xf32> to vector<2x8x8xf32>
    %181 = arith.mulf %176, %180 : vector<2x8x8xf32>
    "tpu.trace_start"() <{level = 10 : i32, message = "bqk,bkd->bqd"}> : () -> ()
    %cst_64 = arith.constant dense<0.000000e+00> : vector<2x8x8xf32>
    %182 = tpu.matmul %181, %168, %cst_64 {dimension_numbers = #tpu.dot_dimension_numbers<[2], [1], [1], [2], [0, 0, 0, 1, 1, 2], [0], [0]>} : vector<2x8x8xf32>, vector<2x8x8xf32>, vector<2x8x8xf32> -> vector<2x8x8xf32>
    "tpu.trace_stop"() : () -> ()
    %183 = vector.extract_strided_slice %137 {offsets = [0, 16], sizes = [16, 8], strides = [1, 1]} : vector<16x32xf32> to vector<16x8xf32>
    %184 = vector.shape_cast %183 : vector<16x8xf32> to vector<2x8x8xf32>
    %185 = vector.extract_strided_slice %142 {offsets = [0, 16], sizes = [16, 8], strides = [1, 1]} : vector<16x64xf32> to vector<16x8xf32>
    %186 = vector.shape_cast %185 : vector<16x8xf32> to vector<2x8x8xf32>
    %187 = vector.extract_strided_slice %142 {offsets = [0, 48], sizes = [16, 8], strides = [1, 1]} : vector<16x64xf32> to vector<16x8xf32>
    %188 = vector.shape_cast %187 : vector<16x8xf32> to vector<2x8x8xf32>
    "tpu.trace_start"() <{level = 10 : i32, message = "bqd,bkd->bqk"}> : () -> ()
    %cst_65 = arith.constant dense<0.000000e+00> : vector<2x8x8xf32>
    %189 = tpu.matmul %184, %186, %cst_65 {dimension_numbers = #tpu.dot_dimension_numbers<[2], [2], [1], [1], [0, 0, 0, 1, 1, 1], [0], [0]>} : vector<2x8x8xf32>, vector<2x8x8xf32>, vector<2x8x8xf32> -> vector<2x8x8xf32>
    "tpu.trace_stop"() : () -> ()
    %cst_66 = arith.constant 0.353553385 : f32
    %190 = vector.broadcast %cst_66 : f32 to vector<2x8x8xf32>
    %191 = arith.mulf %189, %190 : vector<2x8x8xf32>
    %cst_67 = arith.constant dense<0xFF800000> : vector<2x8xf32>
    %192 = vector.multi_reduction <maximumf>, %191, %cst_67 [2] : vector<2x8x8xf32> to vector<2x8xf32>
    %193 = vector.shape_cast %192 : vector<2x8xf32> to vector<2x8x1xf32>
    %194 = vector.broadcast %193 : vector<2x8x1xf32> to vector<2x8x8xf32>
    %195 = arith.subf %191, %194 : vector<2x8x8xf32>
    %196 = math.exp %195 : vector<2x8x8xf32>
    %cst_68 = arith.constant dense<0.000000e+00> : vector<2x8xf32>
    %197 = vector.multi_reduction <add>, %196, %cst_68 [2] : vector<2x8x8xf32> to vector<2x8xf32>
    %198 = vector.shape_cast %197 : vector<2x8xf32> to vector<2x8x1xf32>
    %199 = tpu.reciprocal %198 {approx = true} : vector<2x8x1xf32> -> vector<2x8x1xf32>
    %200 = vector.broadcast %199 : vector<2x8x1xf32> to vector<2x8x8xf32>
    %201 = arith.mulf %196, %200 : vector<2x8x8xf32>
    "tpu.trace_start"() <{level = 10 : i32, message = "bqk,bkd->bqd"}> : () -> ()
    %cst_69 = arith.constant dense<0.000000e+00> : vector<2x8x8xf32>
    %202 = tpu.matmul %201, %188, %cst_69 {dimension_numbers = #tpu.dot_dimension_numbers<[2], [1], [1], [2], [0, 0, 0, 1, 1, 2], [0], [0]>} : vector<2x8x8xf32>, vector<2x8x8xf32>, vector<2x8x8xf32> -> vector<2x8x8xf32>
    "tpu.trace_stop"() : () -> ()
    %203 = vector.extract_strided_slice %137 {offsets = [0, 24], sizes = [16, 8], strides = [1, 1]} : vector<16x32xf32> to vector<16x8xf32>
    %204 = vector.shape_cast %203 : vector<16x8xf32> to vector<2x8x8xf32>
    %205 = vector.extract_strided_slice %142 {offsets = [0, 24], sizes = [16, 8], strides = [1, 1]} : vector<16x64xf32> to vector<16x8xf32>
    %206 = vector.shape_cast %205 : vector<16x8xf32> to vector<2x8x8xf32>
    %207 = vector.extract_strided_slice %142 {offsets = [0, 56], sizes = [16, 8], strides = [1, 1]} : vector<16x64xf32> to vector<16x8xf32>
    %208 = vector.shape_cast %207 : vector<16x8xf32> to vector<2x8x8xf32>
    "tpu.trace_start"() <{level = 10 : i32, message = "bqd,bkd->bqk"}> : () -> ()
    %cst_70 = arith.constant dense<0.000000e+00> : vector<2x8x8xf32>
    %209 = tpu.matmul %204, %206, %cst_70 {dimension_numbers = #tpu.dot_dimension_numbers<[2], [2], [1], [1], [0, 0, 0, 1, 1, 1], [0], [0]>} : vector<2x8x8xf32>, vector<2x8x8xf32>, vector<2x8x8xf32> -> vector<2x8x8xf32>
    "tpu.trace_stop"() : () -> ()
    %cst_71 = arith.constant 0.353553385 : f32
    %210 = vector.broadcast %cst_71 : f32 to vector<2x8x8xf32>
    %211 = arith.mulf %209, %210 : vector<2x8x8xf32>
    %cst_72 = arith.constant dense<0xFF800000> : vector<2x8xf32>
    %212 = vector.multi_reduction <maximumf>, %211, %cst_72 [2] : vector<2x8x8xf32> to vector<2x8xf32>
    %213 = vector.shape_cast %212 : vector<2x8xf32> to vector<2x8x1xf32>
    %214 = vector.broadcast %213 : vector<2x8x1xf32> to vector<2x8x8xf32>
    %215 = arith.subf %211, %214 : vector<2x8x8xf32>
    %216 = math.exp %215 : vector<2x8x8xf32>
    %cst_73 = arith.constant dense<0.000000e+00> : vector<2x8xf32>
    %217 = vector.multi_reduction <add>, %216, %cst_73 [2] : vector<2x8x8xf32> to vector<2x8xf32>
    %218 = vector.shape_cast %217 : vector<2x8xf32> to vector<2x8x1xf32>
    %219 = tpu.reciprocal %218 {approx = true} : vector<2x8x1xf32> -> vector<2x8x1xf32>
    %220 = vector.broadcast %219 : vector<2x8x1xf32> to vector<2x8x8xf32>
    %221 = arith.mulf %216, %220 : vector<2x8x8xf32>
    "tpu.trace_start"() <{level = 10 : i32, message = "bqk,bkd->bqd"}> : () -> ()
    %cst_74 = arith.constant dense<0.000000e+00> : vector<2x8x8xf32>
    %222 = tpu.matmul %221, %208, %cst_74 {dimension_numbers = #tpu.dot_dimension_numbers<[2], [1], [1], [2], [0, 0, 0, 1, 1, 2], [0], [0]>} : vector<2x8x8xf32>, vector<2x8x8xf32>, vector<2x8x8xf32> -> vector<2x8x8xf32>
    "tpu.trace_stop"() : () -> ()
    %223 = tpu.concatenate %162, %182, %202, %222 in 2 : vector<2x8x8xf32>, vector<2x8x8xf32>, vector<2x8x8xf32>, vector<2x8x8xf32> -> vector<2x8x32xf32>
    %224 = vector.shape_cast %223 : vector<2x8x32xf32> to vector<16x32xf32>
    %c0_75 = arith.constant 0 : index
    %c0_76 = arith.constant 0 : index
    %225 = vector.load %arg12[%c0_75, %c0_76] : memref<32x32xf32, #tpu.memory_space<vmem>>, vector<32x32xf32>
    %cst_77 = arith.constant dense<0.000000e+00> : vector<16x32xf32>
    %226 = tpu.matmul %224, %225, %cst_77 {dimension_numbers = #tpu.dot_dimension_numbers<[1], [0], [0], [1], [0, 0, 1, 1], [], []>} : vector<16x32xf32>, vector<32x32xf32>, vector<16x32xf32> -> vector<16x32xf32>
    %c0_78 = arith.constant 0 : index
    %c0_79 = arith.constant 0 : index
    %227 = vector.load %arg13[%c0_78, %c0_79] : memref<1x32xf32, #tpu.memory_space<vmem>>, vector<1x32xf32>
    %228 = vector.broadcast %227 : vector<1x32xf32> to vector<16x32xf32>
    %229 = arith.addf %226, %228 : vector<16x32xf32>
    %230 = arith.addf %132, %229 : vector<16x32xf32>
    %cst_80 = arith.constant dense<0.000000e+00> : vector<16xf32>
    %231 = vector.multi_reduction <add>, %230, %cst_80 [1] : vector<16x32xf32> to vector<16xf32>
    %232 = vector.shape_cast %231 : vector<16xf32> to vector<16x1xf32>
    %cst_81 = arith.constant 3.200000e+01 : f32
    %233 = vector.broadcast %cst_81 : f32 to vector<16x1xf32>
    %234 = arith.divf %232, %233 : vector<16x1xf32>
    %235 = vector.broadcast %234 : vector<16x1xf32> to vector<16x32xf32>
    %236 = arith.subf %230, %235 : vector<16x32xf32>
    %237 = arith.mulf %236, %236 : vector<16x32xf32>
    %cst_82 = arith.constant dense<0.000000e+00> : vector<16xf32>
    %238 = vector.multi_reduction <add>, %237, %cst_82 [1] : vector<16x32xf32> to vector<16xf32>
    %239 = vector.shape_cast %238 : vector<16xf32> to vector<16x1xf32>
    %cst_83 = arith.constant 3.200000e+01 : f32
    %240 = vector.broadcast %cst_83 : f32 to vector<16x1xf32>
    %241 = arith.divf %239, %240 : vector<16x1xf32>
    %242 = vector.broadcast %234 : vector<16x1xf32> to vector<16x32xf32>
    %243 = arith.subf %230, %242 : vector<16x32xf32>
    %cst_84 = arith.constant 9.99999974E-6 : f32
    %244 = vector.broadcast %cst_84 : f32 to vector<16x1xf32>
    %245 = arith.addf %241, %244 : vector<16x1xf32>
    %246 = math.rsqrt %245 : vector<16x1xf32>
    %247 = vector.broadcast %246 : vector<16x1xf32> to vector<16x32xf32>
    %248 = arith.mulf %243, %247 : vector<16x32xf32>
    %c0_85 = arith.constant 0 : index
    %c0_86 = arith.constant 0 : index
    %249 = vector.load %arg20[%c0_85, %c0_86] : memref<1x32xf32, #tpu.memory_space<vmem>>, vector<1x32xf32>
    %250 = vector.broadcast %249 : vector<1x32xf32> to vector<16x32xf32>
    %251 = arith.mulf %248, %250 : vector<16x32xf32>
    %c0_87 = arith.constant 0 : index
    %c0_88 = arith.constant 0 : index
    %252 = vector.load %arg21[%c0_87, %c0_88] : memref<1x32xf32, #tpu.memory_space<vmem>>, vector<1x32xf32>
    %253 = vector.broadcast %252 : vector<1x32xf32> to vector<16x32xf32>
    %254 = arith.addf %251, %253 : vector<16x32xf32>
    %c0_89 = arith.constant 0 : index
    %c0_90 = arith.constant 0 : index
    %255 = vector.load %arg14[%c0_89, %c0_90] : memref<32x64xf32, #tpu.memory_space<vmem>>, vector<32x64xf32>
    %cst_91 = arith.constant dense<0.000000e+00> : vector<16x64xf32>
    %256 = tpu.matmul %254, %255, %cst_91 {dimension_numbers = #tpu.dot_dimension_numbers<[1], [0], [0], [1], [0, 0, 1, 1], [], []>} : vector<16x32xf32>, vector<32x64xf32>, vector<16x64xf32> -> vector<16x64xf32>
    %c0_92 = arith.constant 0 : index
    %c0_93 = arith.constant 0 : index
    %257 = vector.load %arg15[%c0_92, %c0_93] : memref<1x64xf32, #tpu.memory_space<vmem>>, vector<1x64xf32>
    %258 = vector.broadcast %257 : vector<1x64xf32> to vector<16x64xf32>
    %259 = arith.addf %256, %258 : vector<16x64xf32>
    %cst_94 = arith.constant 0.000000e+00 : f32
    %260 = vector.broadcast %cst_94 : f32 to vector<16x64xf32>
    %261 = arith.maximumf %259, %260 : vector<16x64xf32>
    %c0_95 = arith.constant 0 : index
    %c0_96 = arith.constant 0 : index
    %262 = vector.load %arg16[%c0_95, %c0_96] : memref<64x32xf32, #tpu.memory_space<vmem>>, vector<64x32xf32>
    %cst_97 = arith.constant dense<0.000000e+00> : vector<16x32xf32>
    %263 = tpu.matmul %261, %262, %cst_97 {dimension_numbers = #tpu.dot_dimension_numbers<[1], [0], [0], [1], [0, 0, 1, 1], [], []>} : vector<16x64xf32>, vector<64x32xf32>, vector<16x32xf32> -> vector<16x32xf32>
    %c0_98 = arith.constant 0 : index
    %c0_99 = arith.constant 0 : index
    %264 = vector.load %arg17[%c0_98, %c0_99] : memref<1x32xf32, #tpu.memory_space<vmem>>, vector<1x32xf32>
    %265 = vector.broadcast %264 : vector<1x32xf32> to vector<16x32xf32>
    %266 = arith.addf %263, %265 : vector<16x32xf32>
    %267 = arith.addf %254, %266 : vector<16x32xf32>
    %cst_100 = arith.constant dense<0.000000e+00> : vector<16xf32>
    %268 = vector.multi_reduction <add>, %267, %cst_100 [1] : vector<16x32xf32> to vector<16xf32>
    %269 = vector.shape_cast %268 : vector<16xf32> to vector<16x1xf32>
    %cst_101 = arith.constant 3.200000e+01 : f32
    %270 = vector.broadcast %cst_101 : f32 to vector<16x1xf32>
    %271 = arith.divf %269, %270 : vector<16x1xf32>
    %272 = vector.broadcast %271 : vector<16x1xf32> to vector<16x32xf32>
    %273 = arith.subf %267, %272 : vector<16x32xf32>
    %274 = arith.mulf %273, %273 : vector<16x32xf32>
    %cst_102 = arith.constant dense<0.000000e+00> : vector<16xf32>
    %275 = vector.multi_reduction <add>, %274, %cst_102 [1] : vector<16x32xf32> to vector<16xf32>
    %276 = vector.shape_cast %275 : vector<16xf32> to vector<16x1xf32>
    %cst_103 = arith.constant 3.200000e+01 : f32
    %277 = vector.broadcast %cst_103 : f32 to vector<16x1xf32>
    %278 = arith.divf %276, %277 : vector<16x1xf32>
    %279 = vector.broadcast %271 : vector<16x1xf32> to vector<16x32xf32>
    %280 = arith.subf %267, %279 : vector<16x32xf32>
    %cst_104 = arith.constant 9.99999974E-6 : f32
    %281 = vector.broadcast %cst_104 : f32 to vector<16x1xf32>
    %282 = arith.addf %278, %281 : vector<16x1xf32>
    %283 = math.rsqrt %282 : vector<16x1xf32>
    %284 = vector.broadcast %283 : vector<16x1xf32> to vector<16x32xf32>
    %285 = arith.mulf %280, %284 : vector<16x32xf32>
    %c0_105 = arith.constant 0 : index
    %c0_106 = arith.constant 0 : index
    %286 = vector.load %arg22[%c0_105, %c0_106] : memref<1x32xf32, #tpu.memory_space<vmem>>, vector<1x32xf32>
    %287 = vector.broadcast %286 : vector<1x32xf32> to vector<16x32xf32>
    %288 = arith.mulf %285, %287 : vector<16x32xf32>
    %c0_107 = arith.constant 0 : index
    %c0_108 = arith.constant 0 : index
    %289 = vector.load %arg23[%c0_107, %c0_108] : memref<1x32xf32, #tpu.memory_space<vmem>>, vector<1x32xf32>
    %290 = vector.broadcast %289 : vector<1x32xf32> to vector<16x32xf32>
    %291 = arith.addf %288, %290 : vector<16x32xf32>
    %292 = vector.shape_cast %291 : vector<16x32xf32> to vector<2x8x32xf32>
    %c0_109 = arith.constant 0 : index
    %c0_110 = arith.constant 0 : index
    %c0_111 = arith.constant 0 : index
    %293 = vector.load %arg24[%c0_109, %c0_110, %c0_111] : memref<2x8x32xf32, #tpu.memory_space<vmem>>, vector<2x8x32xf32>
    tpu.vector_store %arg24[%c0_109, %c0_110, %c0_111], %292 {strides = array<i32>} : memref<2x8x32xf32, #tpu.memory_space<vmem>>, vector<2x8x32xf32>,
    return
  }
  func.func @transform_0(%arg0: i32) -> (i32, i32, i32) {
    %c0_i32 = arith.constant 0 : i32
    %c0_i32_0 = arith.constant 0 : i32
    %c0_i32_1 = arith.constant 0 : i32
    %c0_i32_2 = arith.constant 0 : i32
    return %c0_i32, %c0_i32_0, %c0_i32_1 : i32, i32, i32
  }
  func.func @transform_1(%arg0: i32) -> (i32, i32, i32) {
    %c0_i32 = arith.constant 0 : i32
    %c0_i32_0 = arith.constant 0 : i32
    %c0_i32_1 = arith.constant 0 : i32
    %c0_i32_2 = arith.constant 0 : i32
    return %c0_i32, %c0_i32_0, %c0_i32_1 : i32, i32, i32
  }
  func.func @transform_2(%arg0: i32) -> (i32, i32) {
    %c0_i32 = arith.constant 0 : i32
    %c0_i32_0 = arith.constant 0 : i32
    %c0_i32_1 = arith.constant 0 : i32
    return %c0_i32, %c0_i32_0 : i32, i32
  }
  func.func @transform_3(%arg0: i32) -> (i32, i32) {
    %c0_i32 = arith.constant 0 : i32
    %c0_i32_0 = arith.constant 0 : i32
    %c0_i32_1 = arith.constant 0 : i32
    return %c0_i32, %c0_i32_0 : i32, i32
  }
  func.func @transform_4(%arg0: i32) -> (i32, i32) {
    %c0_i32 = arith.constant 0 : i32
    %c0_i32_0 = arith.constant 0 : i32
    %c0_i32_1 = arith.constant 0 : i32
    return %c0_i32, %c0_i32_0 : i32, i32
  }
  func.func @transform_5(%arg0: i32) -> (i32, i32) {
    %c0_i32 = arith.constant 0 : i32
    %c0_i32_0 = arith.constant 0 : i32
    %c0_i32_1 = arith.constant 0 : i32
    return %c0_i32, %c0_i32_0 : i32, i32
  }
  func.func @transform_6(%arg0: i32) -> (i32, i32) {
    %c0_i32 = arith.constant 0 : i32
    %c0_i32_0 = arith.constant 0 : i32
    %c0_i32_1 = arith.constant 0 : i32
    return %c0_i32, %c0_i32_0 : i32, i32
  }
  func.func @transform_7(%arg0: i32) -> (i32, i32) {
    %c0_i32 = arith.constant 0 : i32
    %c0_i32_0 = arith.constant 0 : i32
    %c0_i32_1 = arith.constant 0 : i32
    return %c0_i32, %c0_i32_0 : i32, i32
  }
  func.func @transform_8(%arg0: i32) -> (i32, i32) {
    %c0_i32 = arith.constant 0 : i32
    %c0_i32_0 = arith.constant 0 : i32
    %c0_i32_1 = arith.constant 0 : i32
    return %c0_i32, %c0_i32_0 : i32, i32
  }
  func.func @transform_9(%arg0: i32) -> (i32, i32) {
    %c0_i32 = arith.constant 0 : i32
    %c0_i32_0 = arith.constant 0 : i32
    %c0_i32_1 = arith.constant 0 : i32
    return %c0_i32, %c0_i32_0 : i32, i32
  }
  func.func @transform_10(%arg0: i32) -> (i32, i32) {
    %c0_i32 = arith.constant 0 : i32
    %c0_i32_0 = arith.constant 0 : i32
    %c0_i32_1 = arith.constant 0 : i32
    return %c0_i32, %c0_i32_0 : i32, i32
  }
  func.func @transform_11(%arg0: i32) -> (i32, i32) {
    %c0_i32 = arith.constant 0 : i32
    %c0_i32_0 = arith.constant 0 : i32
    %c0_i32_1 = arith.constant 0 : i32
    return %c0_i32, %c0_i32_0 : i32, i32
  }
  func.func @transform_12(%arg0: i32) -> (i32, i32) {
    %c0_i32 = arith.constant 0 : i32
    %c0_i32_0 = arith.constant 0 : i32
    %c0_i32_1 = arith.constant 0 : i32
    return %c0_i32, %c0_i32_0 : i32, i32
  }
  func.func @transform_13(%arg0: i32) -> (i32, i32) {
    %c0_i32 = arith.constant 0 : i32
    %c0_i32_0 = arith.constant 0 : i32
    %c0_i32_1 = arith.constant 0 : i32
    return %c0_i32, %c0_i32_0 : i32, i32
  }
  func.func @transform_14(%arg0: i32) -> (i32, i32) {
    %c0_i32 = arith.constant 0 : i32
    %c0_i32_0 = arith.constant 0 : i32
    %c0_i32_1 = arith.constant 0 : i32
    return %c0_i32, %c0_i32_0 : i32, i32
  }
  func.func @transform_15(%arg0: i32) -> (i32, i32) {
    %c0_i32 = arith.constant 0 : i32
    %c0_i32_0 = arith.constant 0 : i32
    %c0_i32_1 = arith.constant 0 : i32
    return %c0_i32, %c0_i32_0 : i32, i32
  }
  func.func @transform_16(%arg0: i32) -> (i32, i32) {
    %c0_i32 = arith.constant 0 : i32
    %c0_i32_0 = arith.constant 0 : i32
    %c0_i32_1 = arith.constant 0 : i32
    return %c0_i32, %c0_i32_0 : i32, i32
  }
  func.func @transform_17(%arg0: i32) -> (i32, i32) {
    %c0_i32 = arith.constant 0 : i32
    %c0_i32_0 = arith.constant 0 : i32
    %c0_i32_1 = arith.constant 0 : i32
    return %c0_i32, %c0_i32_0 : i32, i32
  }
  func.func @transform_18(%arg0: i32) -> (i32, i32) {
    %c0_i32 = arith.constant 0 : i32
    %c0_i32_0 = arith.constant 0 : i32
    %c0_i32_1 = arith.constant 0 : i32
    return %c0_i32, %c0_i32_0 : i32, i32
  }
  func.func @transform_19(%arg0: i32) -> (i32, i32) {
    %c0_i32 = arith.constant 0 : i32
    %c0_i32_0 = arith.constant 0 : i32
    %c0_i32_1 = arith.constant 0 : i32
    return %c0_i32, %c0_i32_0 : i32, i32
  }
  func.func @transform_20(%arg0: i32) -> (i32, i32) {
    %c0_i32 = arith.constant 0 : i32
    %c0_i32_0 = arith.constant 0 : i32
    %c0_i32_1 = arith.constant 0 : i32
    return %c0_i32, %c0_i32_0 : i32, i32
  }
  func.func @transform_21(%arg0: i32) -> (i32, i32) {
    %c0_i32 = arith.constant 0 : i32
    %c0_i32_0 = arith.constant 0 : i32
    %c0_i32_1 = arith.constant 0 : i32
    return %c0_i32, %c0_i32_0 : i32, i32
  }
  func.func @transform_22(%arg0: i32) -> (i32, i32) {
    %c0_i32 = arith.constant 0 : i32
    %c0_i32_0 = arith.constant 0 : i32
    %c0_i32_1 = arith.constant 0 : i32
    return %c0_i32, %c0_i32_0 : i32, i32
  }
  func.func @transform_23(%arg0: i32) -> (i32, i32, i32) {
    %c0_i32 = arith.constant 0 : i32
    %c0_i32_0 = arith.constant 0 : i32
    %c0_i32_1 = arith.constant 0 : i32
    %c0_i32_2 = arith.constant 0 : i32
    return %c0_i32, %c0_i32_0, %c0_i32_1 : i32, i32, i32
  }
}

</mosaic_0001>

<bundles_post_ra>
// kernel: proposed_decoder_layer.1
= control target key start
LH: loop header
LB: loop body
LE: loop exit
PB: predicated region body
PF: predicated region fallthrough
CT: control target
= control target key end

     0   :  { %s5181_s0 = inlined_call_operand.hbm [shape: f32[2,8,32], index: 0, kind: input, shape index: {}]   ;;  %s5182_s1 = inlined_call_operand.hbm [shape: f32[2,8,32], index: 1, kind: input, shape index: {}]   ;;  %s5183_s2 = inlined_call_operand.hbm [shape: f32[8,8], index: 2, kind: input, shape index: {}]   ;;  %s5184_s3 = inlined_call_operand.vmem [shape: f32[32,96], index: 3, kind: input, shape index: {}]   ;;  %s5185_s4 = inlined_call_operand.vmem [shape: f32[1,96], index: 4, kind: input, shape index: {}]   ;;  %s5186_s5 = inlined_call_operand.vmem [shape: f32[32,32], index: 5, kind: input, shape index: {}]   ;;  %s5187_s6 = inlined_call_operand.vmem [shape: f32[1,32], index: 6, kind: input, shape index: {}]   ;;  %s5188_s7 = inlined_call_operand.vmem [shape: f32[32,32], index: 7, kind: input, shape index: {}]   ;;  %s5189_s8 = inlined_call_operand.vmem [shape: f32[1,32], index: 8, kind: input, shape index: {}]   ;;  %s5190_s9 = inlined_call_operand.hbm [shape: f32[32,64], index: 9, kind: input, shape index: {}]   ;;  %s5191_s10 = inlined_call_operand.vmem [shape: f32[1,64], index: 10, kind: input, shape index: {}]   ;;  %s5192_s11 = inlined_call_operand.hbm [shape: f32[32,32], index: 11, kind: input, shape index: {}]   ;;  %s5193_s12 = inlined_call_operand.vmem [shape: f32[1,32], index: 12, kind: input, shape index: {}]   ;;  %s5194_s13 = inlined_call_operand.hbm [shape: f32[32,64], index: 13, kind: input, shape index: {}]   ;;  %s5195_s14 = inlined_call_operand.vmem [shape: f32[1,64], index: 14, kind: input, shape index: {}]   ;;  %s5196_s15 = inlined_call_operand.vmem [shape: f32[64,32], index: 15, kind: input, shape index: {}]   ;;  %s5197_s16 = inlined_call_operand.vmem [shape: f32[1,32], index: 16, kind: input, shape index: {}]   ;;  %s5198_s17 = inlined_call_operand.vmem [shape: f32[1,32], index: 17, kind: input, shape index: {}]   ;;  %s5199_s18 = inlined_call_operand.vmem [shape: f32[1,32], index: 18, kind: input, shape index: {}]   ;;  %s5200_s19 = inlined_call_operand.vmem [shape: f32[1,32], index: 19, kind: input, shape index: {}]   ;;  %s5201_s20 = inlined_call_operand.vmem [shape: f32[1,32], index: 20, kind: input, shape index: {}]   ;;  %s5202_s21 = inlined_call_operand.vmem [shape: f32[1,32], index: 21, kind: input, shape index: {}]   ;;  %s5203_s22 = inlined_call_operand.vmem [shape: f32[1,32], index: 22, kind: input, shape index: {}]   ;;  %s5204_s23 = inlined_call_operand.hbm [shape: f32[2,8,32], index: 23, kind: output, shape index: {}]  }
   0x1   :  { %5212 = sst [smem:[#allocation19_spill]] %s5181_s0 }
   0x2   :  { %5213 = sst [smem:[#allocation20_spill]] %s5182_s1 }
   0x3   :  { %5214 = sst [smem:[#allocation21_spill]] %s5183_s2 }
   0x4   :  { %5215 = sst [smem:[#allocation22_spill]] %s5184_s3 }
   0x5   :  { %5216 = sst [smem:[#allocation23_spill]] %s5185_s4 }
   0x6   :  { %5217 = sst [smem:[#allocation24_spill]] %s5186_s5 }
   0x7   :  { %5218 = sst [smem:[#allocation25_spill]] %s5187_s6 }
   0x8   :  { %5219 = sst [smem:[#allocation26_spill]] %s5188_s7 }
   0x9   :  { %5220 = sst [smem:[#allocation27_spill]] %s5203_s22 }
   0xa   :  { %5221 = sst [smem:[#allocation28_spill]] %s5204_s23 }
   0xb   :  { %28 = vsyncpa [#allocation3], 0 }
   0xc   :  { %29 = vsyncpa [#allocation6], 0 }
   0xd   :  { %30 = vsyncpa [#allocation9], 0 }
   0xe   :  { %31 = vsyncpa [#allocation12], 0 }
   0xf   :  { %32 = vsyncpa [#allocation4], 0  ;;  %s4452_s4 = smov [#allocation5]   ;;  %s4453_s24 = smov [#allocation8]  }
  0x10   :  { %s50_s30 = sshll.u32 %s4452_s4, 4  ;;  %s84_s25 = sshll.u32 %s4453_s24, 4  ;;  %s51_s30 = int_to_ptr.vmem [resolvable:$true] %s50_s30  ;;  %s4596_s25 = int_to_ptr.vmem [resolvable:$true] %s84_s25 }
  0x11   :  { %s5222_s26 = sld [smem:[#allocation20_spill]] }
  0x17   :  { %s4288_s2 = scalar_lea.hbm %s5222_s26, 256 }
  0x18   :  { %p4289_p0 = scmp.ne.s32.totalorder %s5222_s26, %s4288_s2  ;;  %p4292_p1 = scmp.lt.u32.totalorder %s4288_s2, %s5222_s26 }
  0x1a   :  { %p4294_p2 = pnand %p4292_p1, %p4289_p0 }
  0x1c   :  { %4297 = shalt.err (!%p4294_p2)
}
  0x1d   :  { %s4298_s29 = scalar_lea.vmem %s51_s30, 256  ;;  %p4303_p4 = scmp.lt.s32.totalorder %s51_s30, %s51_s30 }
  0x1e   :  { %p4299_p3 = scmp.ne.s32.totalorder %s51_s30, %s4298_s29  ;;  %p4304_p5 = scmp.lt.s32.totalorder %s4298_s29, %s4298_s29 }
  0x20   :  { %p4305_p6 = por %p4304_p5, %p4303_p4 }
  0x22   :  { %p4306_p7 = pnand %p4305_p6, %p4299_p3 }
  0x24   :  { %4309 = shalt.err (!%p4306_p7)
}
  0x25   :  { %s4454_s3 = smov 128   ;;  %s4455_s0 = smov 8  }
  0x26   :  { %56 = dma.hbm_to_vmem [thread:$0]  %s5222_s26, 256, %s51_s30, [#allocation6], %s4454_s3, %s4454_s3, %s4455_s0  }
  0x27   :  { %s4310_s2 = scalar_lea.hbm %s5190_s9, 512 }
  0x28   :  { %p4311_p8 = scmp.ne.s32.totalorder %s5190_s9, %s4310_s2  ;;  %p4314_p9 = scmp.lt.u32.totalorder %s4310_s2, %s5190_s9 }
  0x2a   :  { %p4316_p10 = pnand %p4314_p9, %p4311_p8 }
  0x2c   :  { %4319 = shalt.err (!%p4316_p10)
}
  0x2d   :  { %s4320_s29 = scalar_lea.vmem %s4596_s25, 512  ;;  %p4325_p12 = scmp.lt.s32.totalorder %s4596_s25, %s4596_s25 }
  0x2e   :  { %p4321_p11 = scmp.ne.s32.totalorder %s4596_s25, %s4320_s29  ;;  %p4326_p13 = scmp.lt.s32.totalorder %s4320_s29, %s4320_s29 }
  0x30   :  { %p4327_p0 = por %p4326_p13, %p4325_p12 }
  0x32   :  { %p4328_p1 = pnand %p4327_p0, %p4321_p11 }
  0x34   :  { %4331 = shalt.err (!%p4328_p1)
}
  0x35   :  { %90 = dma.hbm_to_vmem [thread:$0]  %s5190_s9, 512, %s4596_s25, [#allocation9], %s4454_s3, %s4454_s3, %s4455_s0  }
  0x36   :  { %s4456_s4 = smov [#allocation2]   ;;  %s4457_s5 = smov [#allocation7]  }
  0x37   :  { %s38_s24 = sshll.u32 %s4456_s4, 4  ;;  %s63_s1 = sshll.u32 %s4457_s5, 4  ;;  %s39_s24 = int_to_ptr.vmem [resolvable:$true] %s38_s24  ;;  %s64_s1 = int_to_ptr.vmem [resolvable:$true] %s63_s1 }
  0x38   :  { %s5223_s27 = sld [smem:[#allocation19_spill]] }
  0x3e   :  { %s4332_s7 = scalar_lea.hbm %s5223_s27, 256 }
  0x3f   :  { %p4333_p2 = scmp.ne.s32.totalorder %s5223_s27, %s4332_s7  ;;  %p4336_p3 = scmp.lt.u32.totalorder %s4332_s7, %s5223_s27 }
  0x41   :  { %p4338_p4 = pnand %p4336_p3, %p4333_p2 }
  0x43   :  { %4341 = shalt.err (!%p4338_p4)
}
  0x44   :  { %s4342_s9 = scalar_lea.vmem %s39_s24, 256  ;;  %p4347_p6 = scmp.lt.s32.totalorder %s39_s24, %s39_s24 }
  0x45   :  { %p4343_p5 = scmp.ne.s32.totalorder %s39_s24, %s4342_s9  ;;  %p4348_p7 = scmp.lt.s32.totalorder %s4342_s9, %s4342_s9 }
  0x47   :  { %p4349_p8 = por %p4348_p7, %p4347_p6 }
  0x49   :  { %p4350_p9 = pnand %p4349_p8, %p4343_p5 }
  0x4b   :  { %4353 = shalt.err (!%p4350_p9)
}
  0x4c   :  { %44 = dma.hbm_to_vmem [thread:$0]  %s5223_s27, 256, %s39_s24, [#allocation3], %s4454_s3, %s4454_s3, %s4455_s0  }
  0x4d   :  { %s5224_s22 = sld [smem:[#allocation21_spill]] }
  0x53   :  { %s4354_s23 = scalar_lea.hbm %s5224_s22, 128 }
  0x54   :  { %p4355_p10 = scmp.ne.s32.totalorder %s5224_s22, %s4354_s23  ;;  %p4358_p11 = scmp.lt.u32.totalorder %s4354_s23, %s5224_s22 }
  0x56   :  { %p4360_p12 = pnand %p4358_p11, %p4355_p10 }
  0x58   :  { %4363 = shalt.err (!%p4360_p12)
}
  0x59   :  { %s4364_s28 = scalar_lea.vmem %s64_s1, 128  ;;  %p4369_p0 = scmp.lt.s32.totalorder %s64_s1, %s64_s1 }
  0x5a   :  { %p4365_p13 = scmp.ne.s32.totalorder %s64_s1, %s4364_s28  ;;  %p4370_p1 = scmp.lt.s32.totalorder %s4364_s28, %s4364_s28 }
  0x5c   :  { %p4371_p2 = por %p4370_p1, %p4369_p0 }
  0x5e   :  { %p4372_p3 = pnand %p4371_p2, %p4365_p13 }
  0x60   :  { %4375 = shalt.err (!%p4372_p3)
}
  0x61   :  { %66 = dma.hbm_to_vmem [thread:$0]  %s5224_s22, 128, %s64_s1, [#allocation6]  }
  0x62   :  { %s4458_s29 = smov [#allocation10]   ;;  %s4459_s25 = smov [#allocation11]  }
  0x63   :  { %s98_s9 = sshll.u32 %s4458_s29, 4  ;;  %s112_s30 = sshll.u32 %s4459_s25, 4  ;;  %s99_s9 = int_to_ptr.vmem [resolvable:$true] %s98_s9  ;;  %s4660_s30 = int_to_ptr.vmem [resolvable:$true] %s112_s30 }
  0x64   :  { %s4376_s23 = scalar_lea.hbm %s5192_s11, 512 }
  0x65   :  { %p4377_p4 = scmp.ne.s32.totalorder %s5192_s11, %s4376_s23  ;;  %p4380_p5 = scmp.lt.u32.totalorder %s4376_s23, %s5192_s11 }
  0x67   :  { %p4382_p6 = pnand %p4380_p5, %p4377_p4 }
  0x69   :  { %4385 = shalt.err (!%p4382_p6)
}
  0x6a   :  { %s4386_s1 = scalar_lea.vmem %s99_s9, 512  ;;  %p4391_p8 = scmp.lt.s32.totalorder %s99_s9, %s99_s9 }
  0x6b   :  { %p4387_p7 = scmp.ne.s32.totalorder %s99_s9, %s4386_s1  ;;  %p4392_p9 = scmp.lt.s32.totalorder %s4386_s1, %s4386_s1 }
  0x6d   :  { %p4393_p10 = por %p4392_p9, %p4391_p8 }
  0x6f   :  { %p4394_p11 = pnand %p4393_p10, %p4387_p7 }
  0x71   :  { %4397 = shalt.err (!%p4394_p11)
}
  0x72   :  { %104 = dma.hbm_to_vmem [thread:$0]  %s5192_s11, 512, %s99_s9, [#allocation9], %s4454_s3, %s4454_s3, %s4455_s0  }
  0x73   :  { %s4398_s29 = scalar_lea.hbm %s5194_s13, 512 }
  0x74   :  { %p4399_p12 = scmp.ne.s32.totalorder %s5194_s13, %s4398_s29  ;;  %p4402_p13 = scmp.lt.u32.totalorder %s4398_s29, %s5194_s13 }
  0x76   :  { %p4404_p0 = pnand %p4402_p13, %p4399_p12 }
  0x78   :  { %4407 = shalt.err (!%p4404_p0)
}
  0x79   :  { %s4408_s5 = scalar_lea.vmem %s4660_s30, 512  ;;  %p4413_p2 = scmp.lt.s32.totalorder %s4660_s30, %s4660_s30 }
  0x7a   :  { %p4409_p1 = scmp.ne.s32.totalorder %s4660_s30, %s4408_s5  ;;  %p4414_p3 = scmp.lt.s32.totalorder %s4408_s5, %s4408_s5 }
  0x7c   :  { %p4415_p4 = por %p4414_p3, %p4413_p2 }
  0x7e   :  { %p4416_p5 = pnand %p4415_p4, %p4409_p1 }
  0x80   :  { %4419 = shalt.err (!%p4416_p5)
}
  0x81   :  { %118 = dma.hbm_to_vmem [thread:$0]  %s5194_s13, 512, %s4660_s30, [#allocation12], %s4454_s3, %s4454_s3, %s4455_s0  }
  0x82   :  { %4442 = dma.done.wait [#allocation3], 256  }
  0x83   :  { %4443 = vsyncadd [#allocation3], 4294967040 }
  0x84   :  { %4444 = dma.done.wait [#allocation6], 384  }
  0x85   :  { %4445 = vsyncadd [#allocation6], 4294966912 }
  0x86   :  { %4446 = dma.done.wait [#allocation9], 1024  }
  0x87   :  { %4447 = vsyncadd [#allocation9], 4294966272 }
  0x88   :  { %4448 = dma.done.wait [#allocation12], 512  }
  0x89   :  { %4449 = vsyncadd [#allocation12], 4294966784  ;;  %vm171_vm0 = vcmask 261120   ;;  %s5225_s7 = sld [smem:[#allocation22_spill]]  ;;  %v4709_v5 = vld [vmem:[#allocation2] sm:$0xff]  ;;  %v4713_v7 = vld [vmem:[#allocation2 + $0x8] sm:$0xff] }
  0x8a   :  { %3887 = vmatprep.mubr.msk.f32.mxu1 %vm171_vm0, %v4709_v5  ;;  %v4460_v8 = vmov 0.0   ;;  %vm4461_vm1 = vmmov 0   ;;  %s5226_s25 = sld [smem:[#allocation23_spill]]  ;;  %s4462_s26 = smov 96   ;;  %vm256_vm2 = vcmask 64512   ;;  %v4746_v17 = vld [vmem:[#allocation7] sm:$0xff] }
  0x8b   :  { %3900 = vmatprep.subr.mxu0 %v4460_v8  ;;  %3902 = vmatprep.mubr.msk.f32.mxu0 %vm4461_vm1, %v4460_v8  ;;  %s4463_s4 = smov 64   ;;  %s4464_s23 = smov 88   ;;  %vm1617_vm3 = vcmask 195584   ;;  %vm1614_vm4 = vcmask 130048   ;;  %vm3544_vm5 = vcmask 523264  }
  0x8c   :  { %s4465_s5 = smov 120   ;;  %s4466_s11 = smov 56  }
  0x8d   :  { %s4467_s9 = smov 80   ;;  %s4468_s2 = smov 112  }
  0x8e   :  { %s4469_s6 = smov 48   ;;  %s4471_s1 = smov 104  }
  0x8f   :  { %v160_v0 = vld [vmem:[%s5225_s7] sm:$0xff]  ;;  %v161_v1 = vld [vmem:[%s5225_s7 + $0x8] sm:$0xff]  ;;  %v162_v2 = vld [vmem:[%s5225_s7 + $0x10] sm:$0xff]  ;;  %s4472_s22 = smov 40   ;;  %s4473_s28 = smov 16  }
  0x90   :  { %v4124_v3 = vpack.c.bf16 %v161_v1, %v160_v0  ;;  %v163_v4 = vld [vmem:[%s5225_s7 + $0x18] sm:$0xff]  ;;  %v3694_v9 = vld [vmem:[%s5226_s25] ss:$0 sm:$0xff]  ;;  %s4470_s7 = smov 72   ;;  %s5227_s30 = sld [smem:[#allocation24_spill]] }
  0x91   :  { %v4128_v6 = vpack.c.bf16 %v163_v4, %v162_v2  ;;  %s5229_s25 = sld [smem:[#allocation26_spill]] }
  0x92   :  { %4125 = vmatprep.subr.bf16.mxu1 %v4124_v3 }
  0x93   :  { %4127 = vmatpush3.bf16.msra.mxu1 %v4124_v3 }
  0x94   :  { %4129 = vmatprep.subr.bf16.mxu1 %v4128_v6 }
  0x97   :  { %4131 = vmatpush3.bf16.msra.mxu1 %v4128_v6 }
  0x98   :  { %3890 = vmatprep.subr.mxu1 %v4460_v8 }
  0x9a   :  { %3888 = vmatmul.mubr.msk.f32.vlgmr.msra.gmra.mrb[0].mxu1 %vm171_vm0, %v4713_v7 }
  0x9b   :  { %3892 = vmatprep.mubr.msk.f32.mxu1 %vm4461_vm1, %v4460_v8 }
 0x16d   :  { %v3889_v10 = vpop.f32.mrb[0].mxu1 }
 0x16e   :  { %v244_v11 = vpop.f32.mrb[1].mxu1  ;;  %v4730_v13 = vadd.f32 %v3889_v10, %v3694_v9 }
 0x16f   :  { %v4726_v12 = vadd.f32 %v3694_v9, %v244_v11 }
 0x171   :  { %254 = vrot.lane.b32.xlu0 %v4726_v12, %s4462_s26 }
 0x175   :  { %332 = vrot.lane.b32.xlu0 %v4730_v13, %s4462_s26 }
 0x1e3   :  { %v255_v14 = vpop.permute.xlu0 %254 }
 0x1e4   :  { %3891 = vmatpush3.xpose.msk.msra.mxu1 %vm256_vm2, %v255_v14 }
 0x1e5   :  { %3895 = vmatprep.subr.mxu1 %v4460_v8 }
 0x1e7   :  { %3893 = vmatmul.mubr.msk.f32.vlgmr.msra.gmra.mrb[2].mxu1 %vm256_vm2, %v4726_v12  ;;  %v333_v15 = vpop.permute.xlu0 %332 }
 0x1e8   :  { %3896 = vmatpush3.xpose.msk.msra.mxu1 %vm256_vm2, %v333_v15  ;;  %3897 = vmatprep.mubr.msk.f32.mxu1 %vm4461_vm1, %v4460_v8 }
 0x1e9   :  { %3905 = vmatprep.subr.mxu1 %v4460_v8 }
 0x1eb   :  { %3898 = vmatmul.mubr.msk.f32.vlgmr.msra.gmra.mrb[4].mxu1 %vm256_vm2, %v4730_v13 }
 0x1ec   :  { %3907 = vmatprep.mubr.msk.f32.mxu1 %vm4461_vm1, %v4460_v8 }
 0x2ba   :  { %v327_v16 = vpop.f32.mrb[2].mxu1 }
 0x2bb   :  { %v408_v18 = vmul.f32 0.35355338, %v327_v16  ;;  %v3894_v19 = vpop.f32.mrb[3].mxu1 }
 0x2bd   :  { %v410_v20 = vadd.f32 %v408_v18, %v4746_v17 }
 0x2be   :  { %v404_v21 = vpop.f32.mrb[4].mxu1 }
 0x2bf   :  { %v409_v22 = vmul.f32 0.35355338, %v404_v21  ;;  %v3899_v23 = vpop.f32.mrb[5].mxu1  ;;  %v412_v24 = vsel %vm256_vm2, %v410_v20, -inf }
 0x2c0   :  { %413 = vmax.xlane.f32.xlu1 %v412_v24 }
 0x2c1   :  { %v411_v25 = vadd.f32 %v409_v22, %v4746_v17 }
 0x2c3   :  { %v415_v26 = vsel %vm256_vm2, %v411_v25, -inf }
 0x2c4   :  { %416 = vmax.xlane.f32.xlu1 %v415_v26 }
 0x2d5   :  { %434 = vrot.lane.b32.xlu1 %v4726_v12, %s4463_s4 }
 0x2d9   :  { %510 = vrot.lane.b32.xlu1 %v4730_v13, %s4463_s4 }
 0x2dd   :  { %588 = vrot.lane.b32.xlu1 %v4726_v12, %s4464_s23 }
 0x2e1   :  { %666 = vrot.lane.b32.xlu1 %v4730_v13, %s4464_s23 }
 0x34d   :  { %v414_v27 = vpop.xlane.xlu1 %413 }
 0x34e   :  { %v418_v28 = vsub.f32 %v410_v20, %v414_v27 }
 0x350   :  { %v420_v29 = vmul.f32 1.442695, %v418_v28 }
 0x351   :  { %v417_v30 = vpop.xlane.xlu1 %416 }
 0x352   :  { %4212 = vpow2.f32 %v420_v29  ;;  %v419_v31 = vsub.f32 %v411_v25, %v417_v30 }
 0x354   :  { %v422_v32 = vmul.f32 1.442695, %v419_v31 }
 0x355   :  { %v435_v33 = vpop.permute.xlu1 %434 }
 0x356   :  { %4214 = vpow2.f32 %v422_v32  ;;  %3901 = vmatpush3.msra.mxu0 %v435_v33 }
 0x357   :  { %3910 = vmatprep.subr.mxu0 %v4460_v8 }
 0x359   :  { %v511_v34 = vpop.permute.xlu1 %510 }
 0x35a   :  { %3906 = vmatpush3.msra.mxu1 %v511_v34 }
 0x35b   :  { %3915 = vmatprep.subr.mxu1 %v4460_v8 }
 0x35c   :  { %v4213_v35 = vpop.eup %4212 }
 0x35d   :  { %v424_v36 = vsel %vm256_vm2, %v4213_v35, 0.0  ;;  %v589_v39 = vpop.permute.xlu1 %588 }
 0x35e   :  { %425 = vadd.xlane.f32.xlu0 %v424_v36 }
 0x360   :  { %v4215_v37 = vpop.eup %4214 }
 0x361   :  { %v427_v38 = vsel %vm256_vm2, %v4215_v37, 0.0  ;;  %v667_v40 = vpop.permute.xlu1 %666 }
 0x362   :  { %428 = vadd.xlane.f32.xlu1 %v427_v38 }
 0x373   :  { %664 = vrot.lane.b32.xlu1 %v4730_v13, %s4465_s5 }
 0x374   :  { %586 = vrot.lane.b32.xlu0 %v4726_v12, %s4465_s5 }
 0x3eb   :  { %v426_v41 = vpop.xlane.xlu0 %425 }
 0x3ec   :  { %4216 = vrcp.f32 %v426_v41 }
 0x3ef   :  { %v429_v42 = vpop.xlane.xlu1 %428  ;;  %v587_v47 = vpop.permute.xlu0 %586 }
 0x3f0   :  { %4218 = vrcp.f32 %v429_v42 }
 0x3f3   :  { %v665_v48 = vpop.permute.xlu1 %664 }
 0x3f6   :  { %v4217_v43 = vpop.eup %4216 }
 0x3f7   :  { %v432_v44 = vmul.f32 %v4217_v43, %v4213_v35 }
 0x3f9   :  { %3903 = vmatmul.mubr.msk.f32.vlgmr.msra.gmra.mrb[0].mxu0 %vm256_vm2, %v432_v44 }
 0x3fa   :  { %v4219_v45 = vpop.eup %4218  ;;  %3911 = vmatpush3.xpose.msk.msra.mxu0 %vm256_vm2, %v589_v39  ;;  %3912 = vmatprep.mubr.msk.f32.mxu0 %vm4461_vm1, %v4460_v8 }
 0x3fb   :  { %v433_v46 = vmul.f32 %v4219_v45, %v4215_v37  ;;  %3920 = vmatprep.subr.mxu0 %v4460_v8 }
 0x3fd   :  { %3908 = vmatmul.mubr.msk.f32.vlgmr.msra.gmra.mrb[6].mxu1 %vm256_vm2, %v433_v46  ;;  %3913 = vmatmul.mubr.msk.f32.vlgmr.msra.gmra.mrb[2].mxu0 %vm256_vm2, %v587_v47 }
 0x3fe   :  { %3916 = vmatpush3.xpose.msk.msra.mxu1 %vm256_vm2, %v667_v40  ;;  %3917 = vmatprep.mubr.msk.f32.mxu1 %vm4461_vm1, %v4460_v8 }
 0x3ff   :  { %3925 = vmatprep.subr.mxu1 %v4460_v8  ;;  %3922 = vmatprep.mubr.msk.f32.mxu0 %vm4461_vm1, %v4460_v8 }
 0x401   :  { %3918 = vmatmul.mubr.msk.f32.vlgmr.msra.gmra.mrb[8].mxu1 %vm256_vm2, %v665_v48 }
 0x402   :  { %3927 = vmatprep.mubr.msk.f32.mxu1 %vm4461_vm1, %v4460_v8 }
 0x4cc   :  { %v4782_v49 = vpop.f32.mrb[0].mxu0 }
 0x4cd   :  { %v3904_v50 = vpop.f32.mrb[1].mxu0 }
 0x4d0   :  { %v4784_v51 = vpop.f32.mrb[6].mxu1  ;;  %v660_v52 = vpop.f32.mrb[2].mxu0 }
 0x4d1   :  { %v742_v53 = vmul.f32 0.35355338, %v660_v52  ;;  %v3909_v54 = vpop.f32.mrb[7].mxu1  ;;  %v3914_v55 = vpop.f32.mrb[3].mxu0 }
 0x4d3   :  { %v744_v56 = vadd.f32 %v742_v53, %v4746_v17 }
 0x4d4   :  { %v738_v57 = vpop.f32.mrb[8].mxu1 }
 0x4d5   :  { %v743_v58 = vmul.f32 0.35355338, %v738_v57  ;;  %v3919_v59 = vpop.f32.mrb[9].mxu1  ;;  %v746_v60 = vsel %vm256_vm2, %v744_v56, -inf }
 0x4d6   :  { %747 = vmax.xlane.f32.xlu1 %v746_v60 }
 0x4d7   :  { %v745_v61 = vadd.f32 %v743_v58, %v4746_v17 }
 0x4d9   :  { %v749_v62 = vsel %vm256_vm2, %v745_v61, -inf }
 0x4da   :  { %750 = vmax.xlane.f32.xlu0 %v749_v62 }
 0x4e7   :  { %768 = vrot.lane.b32.xlu1 %v4726_v12, %s4466_s11 }
 0x4eb   :  { %922 = vrot.lane.b32.xlu1 %v4726_v12, %s4467_s9 }
 0x4ef   :  { %1000 = vrot.lane.b32.xlu1 %v4730_v13, %s4467_s9 }
 0x4f0   :  { %844 = vrot.lane.b32.xlu0 %v4730_v13, %s4466_s11 }
 0x4f4   :  { %920 = vrot.lane.b32.xlu0 %v4726_v12, %s4468_s2 }
 0x563   :  { %v748_v63 = vpop.xlane.xlu1 %747 }
 0x564   :  { %v752_v0 = vsub.f32 %v744_v56, %v748_v63 }
 0x566   :  { %v754_v1 = vmul.f32 1.442695, %v752_v0 }
 0x567   :  { %v769_v2 = vpop.permute.xlu1 %768  ;;  %v751_v3 = vpop.xlane.xlu0 %750 }
 0x568   :  { %4220 = vpow2.f32 %v754_v1  ;;  %v753_v4 = vsub.f32 %v745_v61, %v751_v3  ;;  %3921 = vmatpush3.msra.mxu0 %v769_v2 }
 0x569   :  { %3930 = vmatprep.subr.mxu0 %v4460_v8 }
 0x56a   :  { %v756_v6 = vmul.f32 1.442695, %v753_v4 }
 0x56b   :  { %v845_v9 = vpop.permute.xlu0 %844  ;;  %v923_v16 = vpop.permute.xlu1 %922 }
 0x56c   :  { %4222 = vpow2.f32 %v756_v6  ;;  %3926 = vmatpush3.msra.mxu1 %v845_v9 }
 0x56d   :  { %3935 = vmatprep.subr.mxu1 %v4460_v8 }
 0x56f   :  { %v1001_v18 = vpop.permute.xlu1 %1000  ;;  %v921_v25 = vpop.permute.xlu0 %920 }
 0x572   :  { %v4221_v10 = vpop.eup %4220 }
 0x573   :  { %v758_v11 = vsel %vm256_vm2, %v4221_v10, 0.0 }
 0x574   :  { %759 = vadd.xlane.f32.xlu1 %v758_v11 }
 0x576   :  { %v4223_v14 = vpop.eup %4222 }
 0x577   :  { %v761_v15 = vsel %vm256_vm2, %v4223_v14, 0.0 }
 0x578   :  { %762 = vadd.xlane.f32.xlu1 %v761_v15 }
 0x589   :  { %998 = vrot.lane.b32.xlu1 %v4730_v13, %s4468_s2 }
 0x601   :  { %v760_v19 = vpop.xlane.xlu1 %759 }
 0x602   :  { %4224 = vrcp.f32 %v760_v19 }
 0x605   :  { %v763_v20 = vpop.xlane.xlu1 %762 }
 0x606   :  { %4226 = vrcp.f32 %v763_v20 }
 0x609   :  { %v999_v26 = vpop.permute.xlu1 %998 }
 0x60c   :  { %v4225_v21 = vpop.eup %4224 }
 0x60d   :  { %v766_v22 = vmul.f32 %v4225_v21, %v4221_v10 }
 0x60f   :  { %3923 = vmatmul.mubr.msk.f32.vlgmr.msra.gmra.mrb[4].mxu0 %vm256_vm2, %v766_v22 }
 0x610   :  { %v4227_v23 = vpop.eup %4226  ;;  %3931 = vmatpush3.xpose.msk.msra.mxu0 %vm256_vm2, %v923_v16  ;;  %3932 = vmatprep.mubr.msk.f32.mxu0 %vm4461_vm1, %v4460_v8 }
 0x611   :  { %v767_v24 = vmul.f32 %v4227_v23, %v4223_v14  ;;  %3940 = vmatprep.subr.mxu0 %v4460_v8 }
 0x613   :  { %3928 = vmatmul.mubr.msk.f32.vlgmr.msra.gmra.mrb[10].mxu1 %vm256_vm2, %v767_v24  ;;  %3933 = vmatmul.mubr.msk.f32.vlgmr.msra.gmra.mrb[6].mxu0 %vm256_vm2, %v921_v25 }
 0x614   :  { %3936 = vmatpush3.xpose.msk.msra.mxu1 %vm256_vm2, %v1001_v18  ;;  %3937 = vmatprep.mubr.msk.f32.mxu1 %vm4461_vm1, %v4460_v8 }
 0x615   :  { %3945 = vmatprep.subr.mxu1 %v4460_v8  ;;  %3942 = vmatprep.mubr.msk.f32.mxu0 %vm4461_vm1, %v4460_v8 }
 0x617   :  { %3938 = vmatmul.mubr.msk.f32.vlgmr.msra.gmra.mrb[12].mxu1 %vm256_vm2, %v999_v26 }
 0x618   :  { %3947 = vmatprep.mubr.msk.f32.mxu1 %vm4461_vm1, %v4460_v8 }
 0x6e2   :  { %v4820_v27 = vpop.f32.mrb[4].mxu0 }
 0x6e3   :  { %v3924_v28 = vpop.f32.mrb[5].mxu0 }
 0x6e6   :  { %v4822_v29 = vpop.f32.mrb[10].mxu1  ;;  %v994_v30 = vpop.f32.mrb[6].mxu0 }
 0x6e7   :  { %v1076_v31 = vmul.f32 0.35355338, %v994_v30  ;;  %v3929_v32 = vpop.f32.mrb[11].mxu1  ;;  %v3934_v33 = vpop.f32.mrb[7].mxu0 }
 0x6e9   :  { %v1078_v34 = vadd.f32 %v1076_v31, %v4746_v17 }
 0x6ea   :  { %v1072_v35 = vpop.f32.mrb[12].mxu1 }
 0x6eb   :  { %v1077_v36 = vmul.f32 0.35355338, %v1072_v35  ;;  %v3939_v37 = vpop.f32.mrb[13].mxu1  ;;  %v1080_v38 = vsel %vm256_vm2, %v1078_v34, -inf }
 0x6ec   :  { %1081 = vmax.xlane.f32.xlu0 %v1080_v38  ;;  %v1621_v37 = vld [vmem:[%s5227_s30 + $0x8] sm:$0xff] }
 0x6ed   :  { %v1079_v39 = vadd.f32 %v1077_v36, %v4746_v17 }
 0x6ef   :  { %v1083_v40 = vsel %vm256_vm2, %v1079_v39, -inf }
 0x6f0   :  { %1084 = vmax.xlane.f32.xlu1 %v1083_v40  ;;  %v1623_v40 = vld [vmem:[%s5227_s30 + $0x18] sm:$0xff] }
 0x701   :  { %1102 = vrot.lane.b32.xlu1 %v4726_v12, %s4469_s6 }
 0x702   :  { %1178 = vrot.lane.b32.xlu0 %v4730_v13, %s4469_s6 }
 0x705   :  { %1256 = vrot.lane.b32.xlu1 %v4726_v12, %s4470_s7 }
 0x709   :  { %1334 = vrot.lane.b32.xlu1 %v4730_v13, %s4470_s7 }
 0x70d   :  { %1332 = vrot.lane.b32.xlu1 %v4730_v13, %s4471_s1 }
 0x779   :  { %v1082_v41 = vpop.xlane.xlu0 %1081 }
 0x77a   :  { %v1086_v42 = vsub.f32 %v1078_v34, %v1082_v41 }
 0x77c   :  { %v1088_v43 = vmul.f32 1.442695, %v1086_v42 }
 0x77d   :  { %v1085_v44 = vpop.xlane.xlu1 %1084  ;;  %v1179_v45 = vpop.permute.xlu0 %1178 }
 0x77e   :  { %4228 = vpow2.f32 %v1088_v43  ;;  %v1087_v46 = vsub.f32 %v1079_v39, %v1085_v44  ;;  %3946 = vmatpush3.msra.mxu1 %v1179_v45  ;;  %v1622_v39 = vld [vmem:[%s5227_s30 + $0x10] sm:$0xff] }
 0x77f   :  { %3955 = vmatprep.subr.mxu1 %v4460_v8  ;;  %v4136_v41 = vpack.c.bf16 %v1623_v40, %v1622_v39 }
 0x780   :  { %v1090_v47 = vmul.f32 1.442695, %v1087_v46 }
 0x781   :  { %v1103_v48 = vpop.permute.xlu1 %1102 }
 0x782   :  { %4230 = vpow2.f32 %v1090_v47  ;;  %3941 = vmatpush3.msra.mxu0 %v1103_v48 }
 0x783   :  { %3950 = vmatprep.subr.mxu0 %v4460_v8 }
 0x785   :  { %v1257_v57 = vpop.permute.xlu1 %1256 }
 0x788   :  { %v4229_v50 = vpop.eup %4228 }
 0x789   :  { %v1092_v52 = vsel %vm256_vm2, %v4229_v50, 0.0  ;;  %v1335_v61 = vpop.permute.xlu1 %1334 }
 0x78a   :  { %1093 = vadd.xlane.f32.xlu0 %v1092_v52 }
 0x78c   :  { %v4231_v53 = vpop.eup %4230 }
 0x78d   :  { %v1095_v54 = vsel %vm256_vm2, %v4231_v53, 0.0  ;;  %v1333_v0 = vpop.permute.xlu1 %1332 }
 0x78e   :  { %1096 = vadd.xlane.f32.xlu0 %v1095_v54 }
 0x7a4   :  { %1254 = vrot.lane.b32.xlu0 %v4726_v12, %s4471_s1 }
 0x817   :  { %v1094_v55 = vpop.xlane.xlu0 %1093 }
 0x818   :  { %4232 = vrcp.f32 %v1094_v55 }
 0x81b   :  { %v1097_v56 = vpop.xlane.xlu0 %1096 }
 0x81c   :  { %4234 = vrcp.f32 %v1097_v56 }
 0x81f   :  { %v1255_v63 = vpop.permute.xlu0 %1254 }
 0x822   :  { %v4233_v58 = vpop.eup %4232 }
 0x823   :  { %v1100_v59 = vmul.f32 %v4233_v58, %v4229_v50 }
 0x825   :  { %3943 = vmatmul.mubr.msk.f32.vlgmr.msra.gmra.mrb[8].mxu0 %vm256_vm2, %v1100_v59 }
 0x826   :  { %v4235_v60 = vpop.eup %4234  ;;  %3951 = vmatpush3.xpose.msk.msra.mxu0 %vm256_vm2, %v1257_v57  ;;  %3952 = vmatprep.mubr.msk.f32.mxu0 %vm4461_vm1, %v4460_v8 }
 0x827   :  { %v1101_v62 = vmul.f32 %v4235_v60, %v4231_v53  ;;  %3960 = vmatprep.subr.mxu0 %v4460_v8 }
 0x829   :  { %3948 = vmatmul.mubr.msk.f32.vlgmr.msra.gmra.mrb[14].mxu1 %vm256_vm2, %v1101_v62  ;;  %3953 = vmatmul.mubr.msk.f32.vlgmr.msra.gmra.mrb[10].mxu0 %vm256_vm2, %v1255_v63 }
 0x82a   :  { %3956 = vmatpush3.xpose.msk.msra.mxu1 %vm256_vm2, %v1335_v61  ;;  %3957 = vmatprep.mubr.msk.f32.mxu1 %vm4461_vm1, %v4460_v8 }
 0x82b   :  { %3965 = vmatprep.subr.mxu1 %v4460_v8  ;;  %3962 = vmatprep.mubr.msk.f32.mxu0 %vm4461_vm1, %v4460_v8 }
 0x82d   :  { %3958 = vmatmul.mubr.msk.f32.vlgmr.msra.gmra.mrb[16].mxu1 %vm256_vm2, %v1333_v0 }
 0x82e   :  { %3967 = vmatprep.mubr.msk.f32.mxu1 %vm4461_vm1, %v4460_v8 }
 0x8f8   :  { %v1174_v1 = vpop.f32.mrb[8].mxu0 }
 0x8f9   :  { %v3944_v2 = vpop.f32.mrb[9].mxu0 }
 0x8fc   :  { %v1250_v3 = vpop.f32.mrb[14].mxu1  ;;  %v1328_v4 = vpop.f32.mrb[10].mxu0 }
 0x8fd   :  { %v1410_v6 = vmul.f32 0.35355338, %v1328_v4  ;;  %v3949_v9 = vpop.f32.mrb[15].mxu1  ;;  %v3954_v10 = vpop.f32.mrb[11].mxu0 }
 0x8ff   :  { %v1412_v11 = vadd.f32 %v1410_v6, %v4746_v17 }
 0x900   :  { %v1406_v14 = vpop.f32.mrb[16].mxu1 }
 0x901   :  { %v1411_v15 = vmul.f32 0.35355338, %v1406_v14  ;;  %v3959_v16 = vpop.f32.mrb[17].mxu1  ;;  %v1414_v18 = vsel %vm256_vm2, %v1412_v11, -inf }
 0x902   :  { %1415 = vmax.xlane.f32.xlu0 %v1414_v18  ;;  %v1852_v18 = vld [vmem:[#allocation8 + $0x8] sm:$0xff] }
 0x903   :  { %v1413_v19 = vadd.f32 %v1411_v15, %v4746_v17 }
 0x905   :  { %v1417_v20 = vsel %vm256_vm2, %v1413_v19, -inf }
 0x906   :  { %1418 = vmax.xlane.f32.xlu1 %v1417_v20  ;;  %v1759_v20 = vld [vmem:[%s5229_s25] sm:$0xff] }
 0x917   :  { %1436 = vrot.lane.b32.xlu1 %v4726_v12, %s4472_s22 }
 0x91b   :  { %1590 = vrot.lane.b32.xlu1 %v4820_v27, %s4455_s0 }
 0x91f   :  { %1592 = vrot.lane.b32.xlu1 %v4822_v29, %s4455_s0 }
 0x923   :  { %1600 = vrot.lane.b32.xlu1 %v1250_v3, %s4473_s28 }
 0x98f   :  { %v1416_v21 = vpop.xlane.xlu0 %1415 }
 0x990   :  { %v1420_v22 = vsub.f32 %v1412_v11, %v1416_v21  ;;  %v1760_v21 = vld [vmem:[%s5229_s25 + $0x8] sm:$0xff] }
 0x992   :  { %v1422_v23 = vmul.f32 1.442695, %v1420_v22  ;;  %v1853_v22 = vld [vmem:[#allocation8 + $0x10] sm:$0xff] }
 0x993   :  { %v1419_v24 = vpop.xlane.xlu1 %1418 }
 0x994   :  { %4236 = vpow2.f32 %v1422_v23  ;;  %v1421_v17 = vsub.f32 %v1413_v19, %v1419_v24  ;;  %v4140_v23 = vpack.c.bf16 %v1760_v21, %v1759_v20  ;;  %v1854_v24 = vld [vmem:[#allocation8 + $0x18] sm:$0xff] }
 0x996   :  { %v1424_v25 = vmul.f32 1.442695, %v1421_v17  ;;  %v4152_v17 = vpack.c.bf16 %v1854_v24, %v1853_v22 }
 0x997   :  { %v1437_v26 = vpop.permute.xlu1 %1436 }
 0x998   :  { %4238 = vpow2.f32 %v1424_v25  ;;  %3961 = vmatpush3.msra.mxu0 %v1437_v26  ;;  %v157_v25 = vld [vmem:[#allocation5] sm:$0xff] }
 0x999   :  { %v1761_v26 = vld [vmem:[%s5229_s25 + $0x10] sm:$0xff] }
 0x99b   :  { %v1591_v46 = vpop.permute.xlu1 %1590 }
 0x99c   :  { %v1612_v50 = vsel %vm256_vm2, %v4782_v49, %v1591_v46 }
 0x99e   :  { %v4237_v12 = vpop.eup %4236 }
 0x99f   :  { %v1426_v28 = vsel %vm256_vm2, %v4237_v12, 0.0  ;;  %v1593_v47 = vpop.permute.xlu1 %1592 }
 0x9a0   :  { %1427 = vadd.xlane.f32.xlu0 %v1426_v28  ;;  %v1613_v56 = vsel %vm256_vm2, %v4784_v51, %v1593_v47 }
 0x9a2   :  { %v4239_v27 = vpop.eup %4238 }
 0x9a3   :  { %v1429_v29 = vsel %vm256_vm2, %v4239_v27, 0.0  ;;  %v1601_v52 = vpop.permute.xlu1 %1600 }
 0x9a4   :  { %1430 = vadd.xlane.f32.xlu0 %v1429_v29  ;;  %v1616_v57 = vsel %vm1614_vm4, %v1613_v56, %v1601_v52 }
 0x9ba   :  { %1512 = vrot.lane.b32.xlu0 %v4730_v13, %s4472_s22  ;;  %v1620_v13 = vld [vmem:[%s5227_s30] sm:$0xff]  ;;  %s4474_s22 = smov 24   ;;  %s5228_s30 = sld [smem:[#allocation25_spill]] }
 0x9bb   :  { %v4132_v38 = vpack.c.bf16 %v1621_v37, %v1620_v13  ;;  %v3725_v37 = vld [vmem:[%s5199_s18] ss:$0 sm:$0xff] }
 0x9bd   :  { %4133 = vmatprep.subr.bf16.mxu0 %v4132_v38 }
 0x9be   :  { %1598 = vrot.lane.b32.xlu0 %v1174_v1, %s4473_s28 }
 0x9c0   :  { %v3721_v49 = vld [vmem:[%s5228_s30] ss:$0 sm:$0xff] }
 0xa2d   :  { %v1428_v30 = vpop.xlane.xlu0 %1427 }
 0xa2e   :  { %4240 = vrcp.f32 %v1428_v30 }
 0xa31   :  { %v1431_v31 = vpop.xlane.xlu0 %1430 }
 0xa32   :  { %4242 = vrcp.f32 %v1431_v31 }
 0xa35   :  { %v1513_v32 = vpop.permute.xlu0 %1512 }
 0xa36   :  { %3966 = vmatpush3.msra.mxu1 %v1513_v32 }
 0xa37   :  { %4141 = vmatprep.subr.bf16.mxu1 %v4140_v23 }
 0xa38   :  { %v4241_v33 = vpop.eup %4240 }
 0xa39   :  { %v1434_v34 = vmul.f32 %v4241_v33, %v4237_v12  ;;  %v1599_v48 = vpop.permute.xlu0 %1598  ;;  %v1762_v12 = vld [vmem:[%s5229_s25 + $0x18] sm:$0xff] }
 0xa3a   :  { %v1615_v53 = vsel %vm1614_vm4, %v1612_v50, %v1599_v48  ;;  %v4144_v28 = vpack.c.bf16 %v1762_v12, %v1761_v26  ;;  %v3726_v50 = vld [vmem:[%s5189_s8] ss:$0 sm:$0xff] }
 0xa3b   :  { %3963 = vmatmul.mubr.msk.f32.vlgmr.msra.gmra.mrb[12].mxu0 %vm256_vm2, %v1434_v34 }
 0xa3c   :  { %v4243_v35 = vpop.eup %4242  ;;  %4135 = vmatpush3.bf16.msra.mxu0 %v4132_v38 }
 0xa3d   :  { %v1435_v36 = vmul.f32 %v4243_v35, %v4239_v27  ;;  %4137 = vmatprep.subr.bf16.mxu0 %v4136_v41  ;;  %v158_v27 = vld [vmem:[#allocation5 + $0x8] sm:$0xff] }
 0xa3f   :  { %3968 = vmatmul.mubr.msk.f32.vlgmr.msra.gmra.mrb[18].mxu1 %vm256_vm2, %v1435_v36  ;;  %v3724_v36 = vld [vmem:[%s5198_s17] ss:$0 sm:$0xff] }
 0xa40   :  { %4139 = vmatpush3.bf16.msra.mxu0 %v4136_v41  ;;  %4143 = vmatpush3.bf16.msra.mxu1 %v4140_v23 }
 0xa41   :  { %4145 = vmatprep.subr.bf16.mxu1 %v4144_v28 }
 0xa44   :  { %4147 = vmatpush3.bf16.msra.mxu1 %v4144_v28 }
 0xa45   :  { %4003 = vmatprep.subr.mxu1 %v4460_v8 }
 0xb0e   :  { %v1508_v42 = vpop.f32.mrb[12].mxu0 }
 0xb0f   :  { %1606 = vrot.lane.b32.xlu0 %v1508_v42, %s4474_s22  ;;  %v3964_v43 = vpop.f32.mrb[13].mxu0 }
 0xb12   :  { %v1584_v44 = vpop.f32.mrb[18].mxu1 }
 0xb13   :  { %1608 = vrot.lane.b32.xlu1 %v1584_v44, %s4474_s22  ;;  %v3969_v45 = vpop.f32.mrb[19].mxu1  ;;  %v3729_v44 = vld [vmem:[%s5191_s10] ss:$0 sm:$0xff] }
 0xb81   :  { %v1607_v54 = vpop.permute.xlu0 %1606 }
 0xb82   :  { %v1618_v55 = vsel %vm1617_vm3, %v1615_v53, %v1607_v54 }
 0xb83   :  { %3978 = vmatprep.mubr.msk.f32.mxu0 %vm171_vm0, %v1618_v55 }
 0xb85   :  { %v1609_v58 = vpop.permute.xlu1 %1608 }
 0xb86   :  { %v1619_v59 = vsel %vm1617_vm3, %v1616_v57, %v1609_v58 }
 0xb87   :  { %3979 = vmatmul.mubr.msk.f32.vlgmr.msra.gmra.mrb[14].mxu0 %vm171_vm0, %v1619_v59 }
 0xb88   :  { %4000 = vmatprep.mubr.msk.f32.mxu0 %vm171_vm0, %v157_v25 }
 0xc5a   :  { %v3980_v60 = vpop.f32.mrb[14].mxu0 }
 0xc5b   :  { %v1709_v61 = vadd.f32 %v3980_v60, %v3721_v49  ;;  %v1703_v62 = vpop.f32.mrb[15].mxu0 }
 0xc5c   :  { %v1704_v63 = vadd.f32 %v3721_v49, %v1703_v62 }
 0xc5d   :  { %v1713_v0 = vadd.f32 %v1709_v61, %v4713_v7 }
 0xc5e   :  { %v1712_v1 = vadd.f32 %v1704_v63, %v4709_v5  ;;  %v1851_v5 = vld [vmem:[#allocation8] sm:$0xff] }
 0xc5f   :  { %v1717_v51 = vsel %vm171_vm0, %v1713_v0, 0.0  ;;  %v4148_v19 = vpack.c.bf16 %v1852_v18, %v1851_v5 }
 0xc60   :  { %1718 = vadd.xlane.f32.xlu1 %v1717_v51  ;;  %v1714_v2 = vsel %vm171_vm0, %v1712_v1, 0.0 }
 0xc61   :  { %1715 = vadd.xlane.f32.xlu0 %v1714_v2  ;;  %4149 = vmatprep.subr.bf16.mxu0 %v4148_v19 }
 0xc62   :  { %4151 = vmatpush3.bf16.msra.mxu0 %v4148_v19 }
 0xc63   :  { %4153 = vmatprep.subr.bf16.mxu0 %v4152_v17 }
 0xc66   :  { %4155 = vmatpush3.bf16.msra.mxu0 %v4152_v17 }
 0xc67   :  { %4013 = vmatprep.subr.mxu0 %v4460_v8 }
 0xc69   :  { %4001 = vmatmul.mubr.msk.f32.vlgmr.msra.gmra.mrb[16].mxu0 %vm171_vm0, %v158_v27 }
 0xc6a   :  { %4015 = vmatprep.mubr.msk.f32.mxu0 %vm4461_vm1, %v4460_v8 }
 0xced   :  { %v1719_v3 = vpop.xlane.xlu1 %1718 }
 0xcee   :  { %v1722_v4 = vmul.f32 0.03125, %v1719_v3  ;;  %v1716_v6 = vpop.xlane.xlu0 %1715 }
 0xcef   :  { %v1721_v9 = vmul.f32 0.03125, %v1716_v6 }
 0xcf0   :  { %v1724_v10 = vsub.f32 %v1713_v0, %v1722_v4 }
 0xcf1   :  { %v1723_v11 = vsub.f32 %v1712_v1, %v1721_v9 }
 0xcf2   :  { %v1726_v16 = vmul.f32 %v1724_v10, %v1724_v10 }
 0xcf3   :  { %v1725_v14 = vmul.f32 %v1723_v11, %v1723_v11 }
 0xcf4   :  { %v1730_v7 = vsel %vm171_vm0, %v1726_v16, 0.0 }
 0xcf5   :  { %v1727_v15 = vsel %vm171_vm0, %v1725_v14, 0.0 }
 0xcf6   :  { %1728 = vadd.xlane.f32.xlu0 %v1727_v15 }
 0xcfa   :  { %1731 = vadd.xlane.f32.xlu0 %v1730_v7 }
 0xd3c   :  { %v4002_v45 = vpop.f32.mrb[16].mxu0 }
 0xd3d   :  { %v4944_v46 = vadd.f32 %v4002_v45, %v3729_v44  ;;  %v1934_v47 = vpop.f32.mrb[17].mxu0 }
 0xd3e   :  { %v4946_v48 = vadd.f32 %v3729_v44, %v1934_v47 }
 0xd83   :  { %v1729_v29 = vpop.xlane.xlu0 %1728 }
 0xd84   :  { %v1733_v30 = vmul.f32 0.03125, %v1729_v29 }
 0xd86   :  { %v1735_v31 = vadd.f32 1e-05, %v1733_v30 }
 0xd87   :  { %v1732_v32 = vpop.xlane.xlu0 %1731 }
 0xd88   :  { %4244 = vrsqrt.f32 %v1735_v31  ;;  %v1734_v33 = vmul.f32 0.03125, %v1732_v32 }
 0xd8a   :  { %v1736_v34 = vadd.f32 1e-05, %v1734_v33 }
 0xd8c   :  { %4246 = vrsqrt.f32 %v1736_v34 }
 0xd92   :  { %v4245_v35 = vpop.eup %4244 }
 0xd93   :  { %v1739_v13 = vmul.f32 %v4245_v35, %v1723_v11 }
 0xd95   :  { %v1748_v38 = vmul.f32 %v3724_v36, %v1739_v13 }
 0xd96   :  { %v4247_v39 = vpop.eup %4246 }
 0xd97   :  { %v1740_v40 = vmul.f32 %v4247_v39, %v1724_v10  ;;  %v4931_v41 = vadd.f32 %v3725_v37, %v1748_v38 }
 0xd99   :  { %v1749_v42 = vmul.f32 %v3724_v36, %v1740_v40  ;;  %3989 = vmatprep.mubr.msk.f32.mxu1 %vm171_vm0, %v4931_v41 }
 0xd9b   :  { %v4935_v43 = vadd.f32 %v3725_v37, %v1749_v42 }
 0xd9d   :  { %3990 = vmatmul.mubr.msk.f32.vlgmr.msra.gmra.mrb[20].mxu1 %vm171_vm0, %v4935_v43 }
 0xd9e   :  { %4005 = vmatprep.mubr.msk.f32.mxu1 %vm4461_vm1, %v4460_v8  ;;  %4004 = vmatpush3.xpose.msk.msra.mxu1 %vm256_vm2, %v4946_v48 }
 0xd9f   :  { %4008 = vmatprep.subr.mxu1 %v4460_v8 }
 0xe70   :  { %v3991_v52 = vpop.f32.mrb[20].mxu1 }
 0xe71   :  { %v1842_v53 = vpop.f32.mrb[21].mxu1  ;;  %v4962_v55 = vadd.f32 %v3991_v52, %v3726_v50 }
 0xe72   :  { %v4954_v54 = vadd.f32 %v3726_v50, %v1842_v53 }
 0xe74   :  { %4006 = vmatmul.mubr.msk.f32.vlgmr.msra.gmra.mrb[22].mxu1 %vm256_vm2, %v4954_v54 }
 0xe75   :  { %4009 = vmatpush3.xpose.msk.msra.mxu1 %vm256_vm2, %v4944_v46  ;;  %4010 = vmatprep.mubr.msk.f32.mxu1 %vm4461_vm1, %v4460_v8 }
 0xe76   :  { %4018 = vmatprep.subr.mxu1 %v4460_v8 }
 0xe78   :  { %4011 = vmatmul.mubr.msk.f32.vlgmr.msra.gmra.mrb[24].mxu1 %vm256_vm2, %v4962_v55 }
 0xe79   :  { %4020 = vmatprep.mubr.msk.f32.mxu1 %vm4461_vm1, %v4460_v8 }
 0xf47   :  { %v2015_v56 = vpop.f32.mrb[22].mxu1 }
 0xf48   :  { %v2095_v57 = vmul.f32 0.35355338, %v2015_v56  ;;  %v4007_v58 = vpop.f32.mrb[23].mxu1 }
 0xf4a   :  { %v2097_v59 = vsel %vm256_vm2, %v2095_v57, -inf }
 0xf4b   :  { %2098 = vmax.xlane.f32.xlu1 %v2097_v59  ;;  %v2091_v49 = vpop.f32.mrb[24].mxu1 }
 0xf4c   :  { %v2096_v60 = vmul.f32 0.35355338, %v2091_v49  ;;  %v4012_v61 = vpop.f32.mrb[25].mxu1 }
 0xf4e   :  { %v2100_v62 = vsel %vm256_vm2, %v2096_v60, -inf }
 0xf4f   :  { %2101 = vmax.xlane.f32.xlu0 %v2100_v62 }
 0xf5c   :  { %2119 = vrot.lane.b32.xlu1 %v4946_v48, %s4462_s26 }
 0xf60   :  { %2273 = vrot.lane.b32.xlu1 %v4946_v48, %s4465_s5 }
 0xf64   :  { %2351 = vrot.lane.b32.xlu1 %v4944_v46, %s4465_s5 }
 0xf65   :  { %2195 = vrot.lane.b32.xlu0 %v4944_v46, %s4462_s26  ;;  %s4475_s26 = smov [#allocation13]  }
 0xfd8   :  { %v2099_v63 = vpop.xlane.xlu1 %2098 }
 0xfd9   :  { %v2103_v0 = vsub.f32 %v2095_v57, %v2099_v63 }
 0xfdb   :  { %v2105_v1 = vmul.f32 1.442695, %v2103_v0 }
 0xfdc   :  { %v2120_v51 = vpop.permute.xlu1 %2119  ;;  %v2102_v2 = vpop.xlane.xlu0 %2101 }
 0xfdd   :  { %4248 = vpow2.f32 %v2105_v1  ;;  %v2104_v3 = vsub.f32 %v2096_v60, %v2102_v2  ;;  %4014 = vmatpush3.msra.mxu0 %v2120_v51 }
 0xfde   :  { %4023 = vmatprep.subr.mxu0 %v4460_v8 }
 0xfdf   :  { %v2107_v4 = vmul.f32 1.442695, %v2104_v3 }
 0xfe0   :  { %v2196_v6 = vpop.permute.xlu0 %2195  ;;  %v2274_v15 = vpop.permute.xlu1 %2273 }
 0xfe1   :  { %4250 = vpow2.f32 %v2107_v4  ;;  %4019 = vmatpush3.msra.mxu1 %v2196_v6 }
 0xfe2   :  { %4028 = vmatprep.subr.mxu1 %v4460_v8 }
 0xfe4   :  { %v2352_v16 = vpop.permute.xlu1 %2351 }
 0xfe7   :  { %v4249_v9 = vpop.eup %4248 }
 0xfe8   :  { %v2109_v10 = vsel %vm256_vm2, %v4249_v9, 0.0 }
 0xfe9   :  { %2110 = vadd.xlane.f32.xlu1 %v2109_v10 }
 0xfeb   :  { %v4251_v11 = vpop.eup %4250 }
 0xfec   :  { %v2112_v14 = vsel %vm256_vm2, %v4251_v11, 0.0 }
 0xfed   :  { %2113 = vadd.xlane.f32.xlu0 %v2112_v14 }
 0xffa   :  { %2349 = vrot.lane.b32.xlu1 %v4962_v55, %s4465_s5 }
0x1003   :  { %2271 = vrot.lane.b32.xlu0 %v4954_v54, %s4465_s5 }
0x1076   :  { %v2111_v7 = vpop.xlane.xlu1 %2110 }
0x1077   :  { %4252 = vrcp.f32 %v2111_v7 }
0x107a   :  { %v2114_v5 = vpop.xlane.xlu0 %2113  ;;  %v2350_v23 = vpop.permute.xlu1 %2349 }
0x107b   :  { %4254 = vrcp.f32 %v2114_v5 }
0x107e   :  { %v2272_v22 = vpop.permute.xlu0 %2271 }
0x1081   :  { %v4253_v18 = vpop.eup %4252 }
0x1082   :  { %v2117_v19 = vmul.f32 %v4253_v18, %v4249_v9 }
0x1084   :  { %4016 = vmatmul.mubr.msk.f32.vlgmr.msra.gmra.mrb[18].mxu0 %vm256_vm2, %v2117_v19 }
0x1085   :  { %v4255_v20 = vpop.eup %4254  ;;  %4024 = vmatpush3.xpose.msk.msra.mxu0 %vm256_vm2, %v2274_v15  ;;  %4025 = vmatprep.mubr.msk.f32.mxu0 %vm4461_vm1, %v4460_v8 }
0x1086   :  { %v2118_v21 = vmul.f32 %v4255_v20, %v4251_v11  ;;  %4033 = vmatprep.subr.mxu0 %v4460_v8 }
0x1088   :  { %4021 = vmatmul.mubr.msk.f32.vlgmr.msra.gmra.mrb[26].mxu1 %vm256_vm2, %v2118_v21  ;;  %4026 = vmatmul.mubr.msk.f32.vlgmr.msra.gmra.mrb[20].mxu0 %vm256_vm2, %v2272_v22 }
0x1089   :  { %4029 = vmatpush3.xpose.msk.msra.mxu1 %vm256_vm2, %v2352_v16  ;;  %4030 = vmatprep.mubr.msk.f32.mxu1 %vm4461_vm1, %v4460_v8 }
0x108a   :  { %4038 = vmatprep.subr.mxu1 %v4460_v8  ;;  %4035 = vmatprep.mubr.msk.f32.mxu0 %vm4461_vm1, %v4460_v8 }
0x108c   :  { %4031 = vmatmul.mubr.msk.f32.vlgmr.msra.gmra.mrb[28].mxu1 %vm256_vm2, %v2350_v23 }
0x108d   :  { %4040 = vmatprep.mubr.msk.f32.mxu1 %vm4461_vm1, %v4460_v8 }
0x1157   :  { %v5003_v24 = vpop.f32.mrb[18].mxu0 }
0x1158   :  { %v4017_v17 = vpop.f32.mrb[19].mxu0 }
0x115b   :  { %v5005_v25 = vpop.f32.mrb[26].mxu1  ;;  %v2345_v26 = vpop.f32.mrb[20].mxu0 }
0x115c   :  { %v2427_v12 = vmul.f32 0.35355338, %v2345_v26  ;;  %v4022_v28 = vpop.f32.mrb[27].mxu1  ;;  %v4027_v27 = vpop.f32.mrb[21].mxu0 }
0x115e   :  { %v2429_v29 = vsel %vm256_vm2, %v2427_v12, -inf }
0x115f   :  { %2430 = vmax.xlane.f32.xlu0 %v2429_v29  ;;  %v2423_v30 = vpop.f32.mrb[28].mxu1 }
0x1160   :  { %v2428_v31 = vmul.f32 0.35355338, %v2423_v30  ;;  %v4032_v32 = vpop.f32.mrb[29].mxu1 }
0x1162   :  { %v2432_v33 = vsel %vm256_vm2, %v2428_v31, -inf }
0x1163   :  { %2433 = vmax.xlane.f32.xlu1 %v2432_v33 }
0x1174   :  { %2451 = vrot.lane.b32.xlu1 %v4946_v48, %s4464_s23 }
0x1175   :  { %2527 = vrot.lane.b32.xlu0 %v4944_v46, %s4464_s23  ;;  %s3679_s23 = sshll.u32 %s4475_s26, 4  ;;  %s3680_s23 = int_to_ptr.vmem [resolvable:$true] %s3679_s23 }
0x1176   :  { %s4420_s5 = scalar_lea.vmem %s3680_s23, 256  ;;  %p4425_p7 = scmp.lt.s32.totalorder %s3680_s23, %s3680_s23 }
0x1177   :  { %p4421_p6 = scmp.ne.s32.totalorder %s3680_s23, %s4420_s5  ;;  %p4426_p8 = scmp.lt.s32.totalorder %s4420_s5, %s4420_s5 }
0x1178   :  { %2605 = vrot.lane.b32.xlu1 %v4946_v48, %s4468_s2 }
0x1179   :  { %p4427_p9 = por %p4426_p8, %p4425_p7 }
0x117b   :  { %p4428_p10 = pnand %p4427_p9, %p4421_p6 }
0x117c   :  { %2683 = vrot.lane.b32.xlu1 %v4944_v46, %s4468_s2 }
0x1180   :  { %2681 = vrot.lane.b32.xlu1 %v4962_v55, %s4468_s2 }
0x11ec   :  { %v2431_v34 = vpop.xlane.xlu0 %2430 }
0x11ed   :  { %v2435_v35 = vsub.f32 %v2427_v12, %v2431_v34 }
0x11ef   :  { %v2437_v36 = vmul.f32 1.442695, %v2435_v35 }
0x11f0   :  { %v2528_v13 = vpop.permute.xlu0 %2527  ;;  %v2434_v37 = vpop.xlane.xlu1 %2433 }
0x11f1   :  { %4256 = vpow2.f32 %v2437_v36  ;;  %v2436_v38 = vsub.f32 %v2428_v31, %v2434_v37  ;;  %4039 = vmatpush3.msra.mxu1 %v2528_v13 }
0x11f2   :  { %4048 = vmatprep.subr.mxu1 %v4460_v8 }
0x11f3   :  { %v2439_v39 = vmul.f32 1.442695, %v2436_v38 }
0x11f4   :  { %v2452_v40 = vpop.permute.xlu1 %2451 }
0x11f5   :  { %4258 = vpow2.f32 %v2439_v39  ;;  %4034 = vmatpush3.msra.mxu0 %v2452_v40 }
0x11f6   :  { %4043 = vmatprep.subr.mxu0 %v4460_v8 }
0x11f8   :  { %v2606_v53 = vpop.permute.xlu1 %2605 }
0x11fb   :  { %v4257_v42 = vpop.eup %4256 }
0x11fc   :  { %v2441_v44 = vsel %vm256_vm2, %v4257_v42, 0.0  ;;  %v2684_v59 = vpop.permute.xlu1 %2683 }
0x11fd   :  { %2442 = vadd.xlane.f32.xlu0 %v2441_v44 }
0x11ff   :  { %v4259_v45 = vpop.eup %4258 }
0x1200   :  { %v2444_v47 = vsel %vm256_vm2, %v4259_v45, 0.0  ;;  %v2682_v61 = vpop.permute.xlu1 %2681 }
0x1201   :  { %2445 = vadd.xlane.f32.xlu0 %v2444_v47 }
0x1217   :  { %2603 = vrot.lane.b32.xlu0 %v4954_v54, %s4468_s2 }
0x128a   :  { %v2443_v50 = vpop.xlane.xlu0 %2442 }
0x128b   :  { %4260 = vrcp.f32 %v2443_v50 }
0x128e   :  { %v2446_v52 = vpop.xlane.xlu0 %2445 }
0x128f   :  { %4262 = vrcp.f32 %v2446_v52 }
0x1292   :  { %v2604_v60 = vpop.permute.xlu0 %2603 }
0x1295   :  { %v4261_v56 = vpop.eup %4260 }
0x1296   :  { %v2449_v57 = vmul.f32 %v4261_v56, %v4257_v42 }
0x1298   :  { %4036 = vmatmul.mubr.msk.f32.vlgmr.msra.gmra.mrb[22].mxu0 %vm256_vm2, %v2449_v57 }
0x1299   :  { %v4263_v58 = vpop.eup %4262  ;;  %4044 = vmatpush3.xpose.msk.msra.mxu0 %vm256_vm2, %v2606_v53  ;;  %4045 = vmatprep.mubr.msk.f32.mxu0 %vm4461_vm1, %v4460_v8 }
0x129a   :  { %v2450_v49 = vmul.f32 %v4263_v58, %v4259_v45  ;;  %4053 = vmatprep.subr.mxu0 %v4460_v8 }
0x129c   :  { %4041 = vmatmul.mubr.msk.f32.vlgmr.msra.gmra.mrb[30].mxu1 %vm256_vm2, %v2450_v49  ;;  %4046 = vmatmul.mubr.msk.f32.vlgmr.msra.gmra.mrb[24].mxu0 %vm256_vm2, %v2604_v60 }
0x129d   :  { %4049 = vmatpush3.xpose.msk.msra.mxu1 %vm256_vm2, %v2684_v59  ;;  %4050 = vmatprep.mubr.msk.f32.mxu1 %vm4461_vm1, %v4460_v8 }
0x129e   :  { %4058 = vmatprep.subr.mxu1 %v4460_v8  ;;  %4055 = vmatprep.mubr.msk.f32.mxu0 %vm4461_vm1, %v4460_v8 }
0x12a0   :  { %4051 = vmatmul.mubr.msk.f32.vlgmr.msra.gmra.mrb[32].mxu1 %vm256_vm2, %v2682_v61 }
0x12a1   :  { %4060 = vmatprep.mubr.msk.f32.mxu1 %vm4461_vm1, %v4460_v8 }
0x136b   :  { %v5041_v62 = vpop.f32.mrb[22].mxu0 }
0x136c   :  { %v4037_v63 = vpop.f32.mrb[23].mxu0 }
0x136f   :  { %v5043_v0 = vpop.f32.mrb[30].mxu1  ;;  %v2677_v1 = vpop.f32.mrb[24].mxu0 }
0x1370   :  { %v2759_v51 = vmul.f32 0.35355338, %v2677_v1  ;;  %v4042_v2 = vpop.f32.mrb[31].mxu1  ;;  %v4047_v3 = vpop.f32.mrb[25].mxu0 }
0x1371   :  { %v3297_v2 = vld [vmem:[#allocation10] sm:$0xff]  ;;  %v3298_v3 = vld [vmem:[#allocation10 + $0x8] sm:$0xff] }
0x1372   :  { %v2761_v4 = vsel %vm256_vm2, %v2759_v51, -inf }
0x1373   :  { %2762 = vmax.xlane.f32.xlu0 %v2761_v4  ;;  %v2755_v6 = vpop.f32.mrb[32].mxu1  ;;  %v4156_v4 = vpack.c.bf16 %v3298_v3, %v3297_v2  ;;  %v3760_v3 = vld [vmem:[%s5201_s20] ss:$0 sm:$0xff] }
0x1374   :  { %v2760_v9 = vmul.f32 0.35355338, %v2755_v6  ;;  %v4052_v10 = vpop.f32.mrb[33].mxu1  ;;  %v3300_v6 = vld [vmem:[#allocation10 + $0x18] sm:$0xff] }
0x1376   :  { %v2764_v11 = vsel %vm256_vm2, %v2760_v9, -inf }
0x1377   :  { %2765 = vmax.xlane.f32.xlu1 %v2764_v11 }
0x1388   :  { %2783 = vrot.lane.b32.xlu1 %v4946_v48, %s4467_s9 }
0x1389   :  { %2859 = vrot.lane.b32.xlu0 %v4944_v46, %s4467_s9 }
0x138c   :  { %2937 = vrot.lane.b32.xlu1 %v4946_v48, %s4471_s1 }
0x1390   :  { %3015 = vrot.lane.b32.xlu1 %v4944_v46, %s4471_s1 }
0x1394   :  { %3013 = vrot.lane.b32.xlu1 %v4962_v55, %s4471_s1 }
0x1400   :  { %v2763_v14 = vpop.xlane.xlu0 %2762 }
0x1401   :  { %v2767_v15 = vsub.f32 %v2759_v51, %v2763_v14 }
0x1403   :  { %v2769_v16 = vmul.f32 1.442695, %v2767_v15 }
0x1404   :  { %v2860_v7 = vpop.permute.xlu0 %2859  ;;  %v2766_v5 = vpop.xlane.xlu1 %2765 }
0x1405   :  { %4264 = vpow2.f32 %v2769_v16  ;;  %v2768_v18 = vsub.f32 %v2760_v9, %v2766_v5  ;;  %4059 = vmatpush3.msra.mxu1 %v2860_v7 }
0x1406   :  { %4068 = vmatprep.subr.mxu1 %v4460_v8 }
0x1407   :  { %v2771_v19 = vmul.f32 1.442695, %v2768_v18 }
0x1408   :  { %v2784_v20 = vpop.permute.xlu1 %2783 }
0x1409   :  { %4266 = vpow2.f32 %v2771_v19  ;;  %4054 = vmatpush3.msra.mxu0 %v2784_v20 }
0x140a   :  { %4063 = vmatprep.subr.mxu0 %v4460_v8 }
0x140c   :  { %v2938_v12 = vpop.permute.xlu1 %2937 }
0x140f   :  { %v4265_v21 = vpop.eup %4264 }
0x1410   :  { %v2773_v22 = vsel %vm256_vm2, %v4265_v21, 0.0  ;;  %v3016_v30 = vpop.permute.xlu1 %3015 }
0x1411   :  { %2774 = vadd.xlane.f32.xlu0 %v2773_v22 }
0x1413   :  { %v4267_v55 = vpop.eup %4266 }
0x1414   :  { %v2776_v23 = vsel %vm256_vm2, %v4267_v55, 0.0  ;;  %v3014_v32 = vpop.permute.xlu1 %3013 }
0x1415   :  { %2777 = vadd.xlane.f32.xlu0 %v2776_v23 }
0x142b   :  { %2935 = vrot.lane.b32.xlu0 %v4954_v54, %s4471_s1 }
0x149e   :  { %v2775_v17 = vpop.xlane.xlu0 %2774 }
0x149f   :  { %4268 = vrcp.f32 %v2775_v17 }
0x14a2   :  { %v2778_v26 = vpop.xlane.xlu0 %2777 }
0x14a3   :  { %4270 = vrcp.f32 %v2778_v26 }
0x14a6   :  { %v2936_v54 = vpop.permute.xlu0 %2935 }
0x14a9   :  { %v4269_v28 = vpop.eup %4268 }
0x14aa   :  { %v2781_v27 = vmul.f32 %v4269_v28, %v4265_v21 }
0x14ac   :  { %4056 = vmatmul.mubr.msk.f32.vlgmr.msra.gmra.mrb[26].mxu0 %vm256_vm2, %v2781_v27 }
0x14ad   :  { %v4271_v29 = vpop.eup %4270  ;;  %4064 = vmatpush3.xpose.msk.msra.mxu0 %vm256_vm2, %v2938_v12  ;;  %4065 = vmatprep.mubr.msk.f32.mxu0 %vm4461_vm1, %v4460_v8 }
0x14ae   :  { %v2782_v31 = vmul.f32 %v4271_v29, %v4267_v55  ;;  %4073 = vmatprep.subr.mxu0 %v4460_v8 }
0x14b0   :  { %4061 = vmatmul.mubr.msk.f32.vlgmr.msra.gmra.mrb[34].mxu1 %vm256_vm2, %v2782_v31  ;;  %4066 = vmatmul.mubr.msk.f32.vlgmr.msra.gmra.mrb[28].mxu0 %vm256_vm2, %v2936_v54 }
0x14b1   :  { %4069 = vmatpush3.xpose.msk.msra.mxu1 %vm256_vm2, %v3016_v30  ;;  %4070 = vmatprep.mubr.msk.f32.mxu1 %vm4461_vm1, %v4460_v8 }
0x14b2   :  { %4078 = vmatprep.subr.mxu1 %v4460_v8  ;;  %4075 = vmatprep.mubr.msk.f32.mxu0 %vm4461_vm1, %v4460_v8 }
0x14b4   :  { %4071 = vmatmul.mubr.msk.f32.vlgmr.msra.gmra.mrb[36].mxu1 %vm256_vm2, %v3014_v32 }
0x14b5   :  { %4080 = vmatprep.mubr.msk.f32.mxu1 %vm4461_vm1, %v4460_v8 }
0x157f   :  { %v2855_v33 = vpop.f32.mrb[26].mxu0 }
0x1580   :  { %v4057_v34 = vpop.f32.mrb[27].mxu0 }
0x1583   :  { %v2931_v35 = vpop.f32.mrb[34].mxu1  ;;  %v3009_v36 = vpop.f32.mrb[28].mxu0 }
0x1584   :  { %v3091_v13 = vmul.f32 0.35355338, %v3009_v36  ;;  %v4062_v37 = vpop.f32.mrb[35].mxu1  ;;  %v4067_v38 = vpop.f32.mrb[29].mxu0 }
0x1586   :  { %v3093_v39 = vsel %vm256_vm2, %v3091_v13, -inf }
0x1587   :  { %3094 = vmax.xlane.f32.xlu0 %v3093_v39  ;;  %v3087_v40 = vpop.f32.mrb[36].mxu1 }
0x1588   :  { %v3092_v42 = vmul.f32 0.35355338, %v3087_v40  ;;  %v4072_v44 = vpop.f32.mrb[37].mxu1  ;;  %v3436_v40 = vld [vmem:[#allocation11 + $0x8] sm:$0xff] }
0x1589   :  { %v3437_v44 = vld [vmem:[#allocation11 + $0x10] sm:$0xff] }
0x158a   :  { %v3096_v45 = vsel %vm256_vm2, %v3092_v42, -inf }
0x158b   :  { %3097 = vmax.xlane.f32.xlu1 %v3096_v45  ;;  %v3438_v45 = vld [vmem:[#allocation11 + $0x18] sm:$0xff] }
0x159c   :  { %3115 = vrot.lane.b32.xlu1 %v4946_v48, %s4470_s7 }
0x15a0   :  { %3269 = vrot.lane.b32.xlu1 %v5041_v62, %s4455_s0 }
0x15a4   :  { %3271 = vrot.lane.b32.xlu1 %v5043_v0, %s4455_s0 }
0x15a8   :  { %3279 = vrot.lane.b32.xlu1 %v2931_v35, %s4473_s28 }
0x1614   :  { %v3095_v8 = vpop.xlane.xlu0 %3094 }
0x1615   :  { %v3099_v47 = vsub.f32 %v3091_v13, %v3095_v8  ;;  %v4168_v8 = vpack.c.bf16 %v3438_v45, %v3437_v44  ;;  %v3767_v44 = vld [vmem:[%s5202_s21] ss:$0 sm:$0xff] }
0x1617   :  { %v3101_v50 = vmul.f32 1.442695, %v3099_v47  ;;  %v3529_v47 = vld [vmem:[%s5196_s15] sm:$0xff] }
0x1618   :  { %v3098_v52 = vpop.xlane.xlu1 %3097 }
0x1619   :  { %4272 = vpow2.f32 %v3101_v50  ;;  %v3100_v53 = vsub.f32 %v3092_v42, %v3098_v52  ;;  %v3530_v50 = vld [vmem:[%s5196_s15 + $0x8] sm:$0xff]  ;;  %v3531_v52 = vld [vmem:[%s5196_s15 + $0x10] sm:$0xff] }
0x161b   :  { %v3103_v56 = vmul.f32 1.442695, %v3100_v53  ;;  %v4172_v53 = vpack.c.bf16 %v3530_v50, %v3529_v47 }
0x161c   :  { %v3116_v57 = vpop.permute.xlu1 %3115 }
0x161d   :  { %4274 = vpow2.f32 %v3103_v56  ;;  %4074 = vmatpush3.msra.mxu0 %v3116_v57  ;;  %v3532_v56 = vld [vmem:[%s5196_s15 + $0x18] sm:$0xff] }
0x161e   :  { %4157 = vmatprep.subr.bf16.mxu0 %v4156_v4  ;;  %v4176_v57 = vpack.c.bf16 %v3532_v56, %v3531_v52 }
0x1620   :  { %v3270_v16 = vpop.permute.xlu1 %3269 }
0x1621   :  { %v3291_v18 = vsel %vm256_vm2, %v5003_v24, %v3270_v16  ;;  %v3756_v24 = vld [vmem:[%s5193_s12] ss:$0 sm:$0xff]  ;;  %s5230_s12 = sld [smem:[#allocation27_spill]] }
0x1623   :  { %v4273_v58 = vpop.eup %4272 }
0x1624   :  { %v3105_v48 = vsel %vm256_vm2, %v4273_v58, 0.0  ;;  %v3272_v7 = vpop.permute.xlu1 %3271 }
0x1625   :  { %3106 = vadd.xlane.f32.xlu0 %v3105_v48  ;;  %v3292_v55 = vsel %vm256_vm2, %v5005_v25, %v3272_v7  ;;  %v3534_v48 = vld [vmem:[%s5196_s15 + $0x28] sm:$0xff]  ;;  %v3761_v7 = vld [vmem:[%s5195_s14] ss:$0 sm:$0xff] }
0x1627   :  { %v4275_v59 = vpop.eup %4274  ;;  %v3768_v50 = vld [vmem:[%s5230_s12] ss:$0 sm:$0xff] }
0x1628   :  { %v3108_v49 = vsel %vm256_vm2, %v4275_v59, 0.0  ;;  %v3280_v19 = vpop.permute.xlu1 %3279 }
0x1629   :  { %3109 = vadd.xlane.f32.xlu0 %v3108_v49  ;;  %v3294_v23 = vsel %vm1614_vm4, %v3292_v55, %v3280_v19  ;;  %v3764_v55 = vld [vmem:[%s5197_s16] ss:$0 sm:$0xff] }
0x163f   :  { %3191 = vrot.lane.b32.xlu0 %v4944_v46, %s4470_s7  ;;  %v3299_v46 = vld [vmem:[#allocation10 + $0x10] sm:$0xff] }
0x1640   :  { %v4160_v9 = vpack.c.bf16 %v3300_v6, %v3299_v46 }
0x1643   :  { %3277 = vrot.lane.b32.xlu0 %v2855_v33, %s4473_s28 }
0x16b2   :  { %v3107_v60 = vpop.xlane.xlu0 %3106 }
0x16b3   :  { %4276 = vrcp.f32 %v3107_v60 }
0x16b6   :  { %v3110_v61 = vpop.xlane.xlu0 %3109 }
0x16b7   :  { %4278 = vrcp.f32 %v3110_v61 }
0x16ba   :  { %v3192_v62 = vpop.permute.xlu0 %3191 }
0x16bb   :  { %4079 = vmatpush3.msra.mxu1 %v3192_v62 }
0x16bd   :  { %v4277_v63 = vpop.eup %4276 }
0x16be   :  { %v3113_v0 = vmul.f32 %v4277_v63, %v4273_v58  ;;  %v3278_v5 = vpop.permute.xlu0 %3277  ;;  %v3533_v58 = vld [vmem:[%s5196_s15 + $0x20] sm:$0xff] }
0x16bf   :  { %v3293_v20 = vsel %vm1614_vm4, %v3291_v18, %v3278_v5 }
0x16c0   :  { %4076 = vmatmul.mubr.msk.f32.vlgmr.msra.gmra.mrb[30].mxu0 %vm256_vm2, %v3113_v0 }
0x16c1   :  { %v4279_v1 = vpop.eup %4278  ;;  %4159 = vmatpush3.bf16.msra.mxu0 %v4156_v4 }
0x16c2   :  { %v3114_v51 = vmul.f32 %v4279_v1, %v4275_v59  ;;  %4161 = vmatprep.subr.bf16.mxu0 %v4160_v9  ;;  %v4180_v59 = vpack.c.bf16 %v3534_v48, %v3533_v58 }
0x16c4   :  { %4081 = vmatmul.mubr.msk.f32.vlgmr.msra.gmra.mrb[38].mxu1 %vm256_vm2, %v3114_v51  ;;  %v3759_v51 = vld [vmem:[%s5200_s19] ss:$0 sm:$0xff] }
0x16c5   :  { %4163 = vmatpush3.bf16.msra.mxu0 %v4160_v9 }
0x16c6   :  { %4173 = vmatprep.subr.bf16.mxu0 %v4172_v53 }
0x1793   :  { %v3187_v10 = vpop.f32.mrb[30].mxu0 }
0x1794   :  { %3285 = vrot.lane.b32.xlu0 %v3187_v10, %s4474_s22  ;;  %v4077_v11 = vpop.f32.mrb[31].mxu0 }
0x1797   :  { %v3263_v14 = vpop.f32.mrb[38].mxu1 }
0x1798   :  { %3287 = vrot.lane.b32.xlu1 %v3263_v14, %s4474_s22  ;;  %v4082_v15 = vpop.f32.mrb[39].mxu1  ;;  %v3535_v14 = vld [vmem:[%s5196_s15 + $0x30] sm:$0xff] }
0x1799   :  { %v3536_v15 = vld [vmem:[%s5196_s15 + $0x38] sm:$0xff] }
0x179a   :  { %v4184_v16 = vpack.c.bf16 %v3536_v15, %v3535_v14 }
0x1806   :  { %v3286_v21 = vpop.permute.xlu0 %3285 }
0x1807   :  { %v3295_v22 = vsel %vm1617_vm3, %v3293_v20, %v3286_v21 }
0x1808   :  { %4091 = vmatprep.mubr.msk.f32.mxu0 %vm171_vm0, %v3295_v22 }
0x180a   :  { %v3288_v17 = vpop.permute.xlu1 %3287 }
0x180b   :  { %v3296_v26 = vsel %vm1617_vm3, %v3294_v23, %v3288_v17 }
0x180c   :  { %4092 = vmatmul.mubr.msk.f32.vlgmr.msra.gmra.mrb[32].mxu0 %vm171_vm0, %v3296_v26 }
0x180d   :  { %4175 = vmatpush3.bf16.msra.mxu0 %v4172_v53 }
0x180e   :  { %4177 = vmatprep.subr.bf16.mxu0 %v4176_v57 }
0x1811   :  { %4179 = vmatpush3.bf16.msra.mxu0 %v4176_v57 }
0x1812   :  { %4181 = vmatprep.subr.bf16.mxu0 %v4180_v59 }
0x1815   :  { %4183 = vmatpush3.bf16.msra.mxu0 %v4180_v59 }
0x1816   :  { %4185 = vmatprep.subr.bf16.mxu0 %v4184_v16 }
0x1819   :  { %4187 = vmatpush3.bf16.msra.mxu0 %v4184_v16 }
0x18df   :  { %v4093_v12 = vpop.f32.mrb[32].mxu0 }
0x18e0   :  { %v3386_v28 = vadd.f32 %v4093_v12, %v3756_v24  ;;  %v3380_v27 = vpop.f32.mrb[33].mxu0 }
0x18e1   :  { %v3381_v29 = vadd.f32 %v3756_v24, %v3380_v27 }
0x18e2   :  { %v3390_v30 = vadd.f32 %v3386_v28, %v4935_v43 }
0x18e3   :  { %v3389_v31 = vadd.f32 %v3381_v29, %v4931_v41  ;;  %v3435_v41 = vld [vmem:[#allocation11] sm:$0xff] }
0x18e4   :  { %v3394_v25 = vsel %vm171_vm0, %v3390_v30, 0.0  ;;  %v4164_v42 = vpack.c.bf16 %v3436_v40, %v3435_v41 }
0x18e5   :  { %3395 = vadd.xlane.f32.xlu1 %v3394_v25  ;;  %v3391_v54 = vsel %vm171_vm0, %v3389_v31, 0.0 }
0x18e6   :  { %3392 = vadd.xlane.f32.xlu0 %v3391_v54  ;;  %4165 = vmatprep.subr.bf16.mxu1 %v4164_v42 }
0x18e7   :  { %4167 = vmatpush3.bf16.msra.mxu1 %v4164_v42 }
0x18e8   :  { %4169 = vmatprep.subr.bf16.mxu1 %v4168_v8 }
0x18eb   :  { %4171 = vmatpush3.bf16.msra.mxu1 %v4168_v8 }
0x1972   :  { %v3396_v32 = vpop.xlane.xlu1 %3395 }
0x1973   :  { %v3398_v33 = vmul.f32 0.03125, %v3396_v32  ;;  %v3393_v34 = vpop.xlane.xlu0 %3392 }
0x1974   :  { %v3397_v35 = vmul.f32 0.03125, %v3393_v34 }
0x1975   :  { %v3400_v36 = vsub.f32 %v3390_v30, %v3398_v33 }
0x1976   :  { %v3399_v13 = vsub.f32 %v3389_v31, %v3397_v35 }
0x1977   :  { %v3402_v39 = vmul.f32 %v3400_v36, %v3400_v36 }
0x1978   :  { %v3401_v37 = vmul.f32 %v3399_v13, %v3399_v13 }
0x1979   :  { %v3406_v43 = vsel %vm171_vm0, %v3402_v39, 0.0 }
0x197a   :  { %v3403_v38 = vsel %vm171_vm0, %v3401_v37, 0.0 }
0x197b   :  { %3404 = vadd.xlane.f32.xlu0 %v3403_v38 }
0x197f   :  { %3407 = vadd.xlane.f32.xlu0 %v3406_v43 }
0x1a08   :  { %v3405_v49 = vpop.xlane.xlu0 %3404 }
0x1a09   :  { %v3409_v60 = vmul.f32 0.03125, %v3405_v49 }
0x1a0b   :  { %v3411_v61 = vadd.f32 1e-05, %v3409_v60 }
0x1a0c   :  { %v3408_v62 = vpop.xlane.xlu0 %3407 }
0x1a0d   :  { %4280 = vrsqrt.f32 %v3411_v61  ;;  %v3410_v63 = vmul.f32 0.03125, %v3408_v62 }
0x1a0f   :  { %v3412_v0 = vadd.f32 1e-05, %v3410_v63 }
0x1a11   :  { %4282 = vrsqrt.f32 %v3412_v0 }
0x1a17   :  { %v4281_v1 = vpop.eup %4280 }
0x1a18   :  { %v3415_v2 = vmul.f32 %v4281_v1, %v3399_v13 }
0x1a1a   :  { %v3424_v4 = vmul.f32 %v3759_v51, %v3415_v2 }
0x1a1b   :  { %v4283_v46 = vpop.eup %4282 }
0x1a1c   :  { %v3416_v6 = vmul.f32 %v4283_v46, %v3400_v36  ;;  %v3433_v9 = vadd.f32 %v3760_v3, %v3424_v4 }
0x1a1e   :  { %v3425_v10 = vmul.f32 %v3759_v51, %v3416_v6  ;;  %4102 = vmatprep.mubr.msk.f32.mxu1 %vm171_vm0, %v3433_v9 }
0x1a20   :  { %v3434_v11 = vadd.f32 %v3760_v3, %v3425_v10 }
0x1a22   :  { %4103 = vmatmul.mubr.msk.f32.vlgmr.msra.gmra.mrb[40].mxu1 %vm171_vm0, %v3434_v11 }
0x1af5   :  { %v4104_v5 = vpop.f32.mrb[40].mxu1 }
0x1af6   :  { %v3524_v18 = vadd.f32 %v4104_v5, %v3761_v7  ;;  %v3518_v19 = vpop.f32.mrb[41].mxu1 }
0x1af7   :  { %v3519_v20 = vadd.f32 %v3761_v7, %v3518_v19 }
0x1af8   :  { %v3528_v22 = vmax.f32 %v3524_v18, 0.0 }
0x1af9   :  { %v3527_v21 = vmax.f32 %v3519_v20, 0.0 }
0x1afb   :  { %4121 = vmatprep.mubr.msk.f32.mxu0 %vm3544_vm5, %v3527_v21 }
0x1afc   :  { %4122 = vmatmul.mubr.msk.f32.vlgmr.msra.gmra.mrb[34].mxu0 %vm3544_vm5, %v3528_v22 }
0x1bcf   :  { %v4123_v23 = vpop.f32.mrb[34].mxu0 }
0x1bd0   :  { %v3623_v17 = vadd.f32 %v4123_v23, %v3764_v55  ;;  %v3617_v26 = vpop.f32.mrb[35].mxu0 }
0x1bd1   :  { %v3618_v24 = vadd.f32 %v3764_v55, %v3617_v26 }
0x1bd2   :  { %v3627_v12 = vadd.f32 %v3623_v17, %v3434_v11 }
0x1bd3   :  { %v3626_v28 = vadd.f32 %v3618_v24, %v3433_v9 }
0x1bd4   :  { %v3631_v27 = vsel %vm171_vm0, %v3627_v12, 0.0 }
0x1bd5   :  { %3632 = vadd.xlane.f32.xlu0 %v3631_v27  ;;  %v3628_v29 = vsel %vm171_vm0, %v3626_v28, 0.0 }
0x1bd6   :  { %3629 = vadd.xlane.f32.xlu1 %v3628_v29 }
0x1c62   :  { %v3633_v30 = vpop.xlane.xlu0 %3632 }
0x1c63   :  { %v3635_v31 = vmul.f32 0.03125, %v3633_v30  ;;  %v3630_v25 = vpop.xlane.xlu1 %3629 }
0x1c64   :  { %v3634_v54 = vmul.f32 0.03125, %v3630_v25 }
0x1c65   :  { %v3637_v32 = vsub.f32 %v3627_v12, %v3635_v31 }
0x1c66   :  { %v3636_v33 = vsub.f32 %v3626_v28, %v3634_v54 }
0x1c67   :  { %v3639_v34 = vmul.f32 %v3637_v32, %v3637_v32 }
0x1c68   :  { %v3638_v35 = vmul.f32 %v3636_v33, %v3636_v33 }
0x1c69   :  { %v3643_v36 = vsel %vm171_vm0, %v3639_v34, 0.0 }
0x1c6a   :  { %3644 = vadd.xlane.f32.xlu0 %v3643_v36  ;;  %v3640_v13 = vsel %vm171_vm0, %v3638_v35, 0.0 }
0x1c6b   :  { %3641 = vadd.xlane.f32.xlu1 %v3640_v13 }
0x1cf7   :  { %v3645_v37 = vpop.xlane.xlu0 %3644 }
0x1cf8   :  { %v3647_v38 = vmul.f32 0.03125, %v3645_v37  ;;  %v3642_v39 = vpop.xlane.xlu1 %3641 }
0x1cf9   :  { %v3646_v43 = vmul.f32 0.03125, %v3642_v39 }
0x1cfa   :  { %v3649_v41 = vadd.f32 1e-05, %v3647_v38 }
0x1cfb   :  { %v3648_v40 = vadd.f32 1e-05, %v3646_v43 }
0x1cfc   :  { %4284 = vrsqrt.f32 %v3649_v41 }
0x1cfd   :  { %4286 = vrsqrt.f32 %v3648_v40 }
0x1d06   :  { %v4285_v42 = vpop.eup %4284 }
0x1d07   :  { %v4287_v45 = vpop.eup %4286  ;;  %v3653_v8 = vmul.f32 %v4285_v42, %v3637_v32 }
0x1d08   :  { %v3652_v47 = vmul.f32 %v4287_v45, %v3636_v33 }
0x1d09   :  { %v3662_v52 = vmul.f32 %v3767_v44, %v3653_v8 }
0x1d0a   :  { %v3661_v53 = vmul.f32 %v3767_v44, %v3652_v47 }
0x1d0b   :  { %v3671_v56 = vadd.f32 %v3768_v50, %v3662_v52 }
0x1d0c   :  { %v3670_v57 = vadd.f32 %v3768_v50, %v3661_v53 }
0x1d0d   :  { %3673 = vst.msk [vmem:[#allocation13 + $0x8] sm:$0xff] %vm171_vm0, %v3671_v56 }
0x1d0e   :  { %3672 = vst.msk [vmem:[#allocation13] sm:$0xff] %vm171_vm0, %v3670_v57 }
0x1d0f   :  { %4431 = shalt.err (!%p4428_p10)
}
0x1d10   :  { %s5231_s2 = sld [smem:[#allocation28_spill]] }
0x1d16   :  { %s4432_s7 = scalar_lea.hbm %s5231_s2, 256 }
0x1d17   :  { %p4433_p11 = scmp.ne.s32.totalorder %s5231_s2, %s4432_s7  ;;  %p4436_p12 = scmp.lt.u32.totalorder %s4432_s7, %s5231_s2 }
0x1d19   :  { %p4438_p13 = pnand %p4436_p12, %p4433_p11 }
0x1d1b   :  { %4441 = shalt.err (!%p4438_p13)
}
0x1d1c   :  { %3685 = dma.vmem_to_hbm [thread:$0]  %s3680_s23, 256, %s5231_s2, [#allocation4], %s4454_s3, %s4454_s3, %s4455_s0  }
0x1d1d   :  { %4450 = dma.done.wait [#allocation4], 256  }
0x1d1e   :  { %4451 = vsyncadd [#allocation4], 4294967040 }
0x1d1f   :  { %3689 = vsyncpa [#allocation3], 1 }
0x1d20   :  { %3690 = vsyncpa [#allocation6], 1 }
0x1d21   :  { %3691 = vsyncpa [#allocation9], 1 }
0x1d22   :  { %3692 = vsyncpa [#allocation12], 1 }
0x1d23   :  { %3693 = vsyncpa [#allocation4], 1 }

</bundles_post_ra>
